<compile_context>
chip_gen: v7x
topology: tpu7x:2x2x1
jax: 0.10.0
libtpu: 0.0.40
codegen_flags: <defaults>
</compile_context>

<pallas_src>
import jax
import jax.numpy as jnp
from jax.experimental import pallas as pl
from jax.experimental.pallas import tpu as pltpu

_BN_EPS = 1e-5   # PyTorch BatchNorm2d default eps


# ----------------------------- kernels --------------------------------------

def _mscam_weight(z, w1, b1, w2, b2, xg):
    """sigmoid(local_mlp(z) + xg) for one (C, S) tile.

    Matmuls take bf16 operands (native MXU pass) with f32 accumulation; bias,
    ReLU and sigmoid stay in f32. The divide is an EUP approx reciprocal.
    """
    h = jnp.dot(w1, z.astype(jnp.bfloat16), preferred_element_type=jnp.float32) + b1
    h = jnp.maximum(h, 0.0)
    xl = jnp.dot(w2, h.astype(jnp.bfloat16), preferred_element_type=jnp.float32) + b2
    return pl.reciprocal(1.0 + jnp.exp(-(xl + xg)), approx=True)


def _iaff_sum_kernel(x_ref, r_ref, w1_ref, b1_ref, w2_ref, b2_ref, xg1_ref,
                     sum_ref):
    """Pass 1: stage-1 blend per spatial tile, accumulate sum(xi) per image."""
    t = pl.program_id(1)
    x = x_ref[0]                        # (C, THW) f32
    r = r_ref[0]
    d = x - r
    wei = _mscam_weight(x + r, w1_ref[0], b1_ref[0], w2_ref[0], b2_ref[0],
                        xg1_ref[0])
    xi = r + d * wei                    # padded lanes: r=d=0 -> xi=0 (sum-safe)

    @pl.when(t == 0)
    def _():
        sum_ref[0] = jnp.zeros_like(sum_ref[0])

    sum_ref[0] += jnp.sum(xi, axis=1, keepdims=True)


def _iaff_out_kernel(x_ref, r_ref, w1_ref, b1_ref, w2_ref, b2_ref,
                     xg1_ref, xg2_ref, o_ref):
    """Pass 2: recompute xi for the tile, apply stage-2 attention, final blend."""
    x = x_ref[0]
    r = r_ref[0]
    d = x - r
    wei = _mscam_weight(x + r, w1_ref[0], b1_ref[0], w2_ref[0], b2_ref[0],
                        xg1_ref[0])
    xi = r + d * wei
    wei2 = _mscam_weight(xi, w1_ref[1], b1_ref[1], w2_ref[1], b2_ref[1],
                         xg2_ref[0])
    o_ref[0] = (r + d * wei2).astype(o_ref.dtype)


# ----------------------------- wrapper ---------------------------------------

def _fold_conv_bn(w, b, gamma, beta, mean, var, eps=_BN_EPS):
    """Fold eval-mode BatchNorm into the preceding 1x1 conv (w:(Co,Ci), b:(Co,))."""
    s = gamma / jnp.sqrt(var + eps)
    return w * s[:, None], (b - mean) * s + beta


def _fold_branch(p):
    w1, b1 = _fold_conv_bn(p["w1"], p["b1"], p["bn1_gamma"], p["bn1_beta"],
                           p["bn1_mean"], p["bn1_var"])
    w2, b2 = _fold_conv_bn(p["w2"], p["b2"], p["bn2_gamma"], p["bn2_beta"],
                           p["bn2_mean"], p["bn2_var"])
    return w1, b1, w2, b2


def _global_mlp(z, w1, b1, w2, b2):
    """Global-attention MLP on (N, C) pooled features (tiny, runs in XLA)."""
    h = jnp.maximum(z @ w1.T + b1, 0.0)
    return h @ w2.T + b2


def _round_up(v, m):
    return (v + m - 1) // m * m


@jax.jit
def iaff_forward(x, residual, params):
    """iAFF forward (eval-mode BN) on NCHW inputs via two spatially-tiled Pallas kernels."""
    assert x.shape == residual.shape and x.dtype == residual.dtype
    n, c, h, w = x.shape
    hw = h * w
    ci = params["local_att"]["w1"].shape[0]

    # Fold BN into the 1x1 convs.
    l1 = _fold_branch(params["local_att"])
    l2 = _fold_branch(params["local_att2"])
    gw1, gb1, gw2, gb2 = _fold_branch(params["global_att"])
    # params["global_att2"] exists in the PyTorch module but forward() never uses it.

    # Stacked local-branch weights: index 0 = local_att (stage 1), 1 = local_att2.
    # Weights bf16 (MXU operands), biases f32 columns broadcasting over lanes.
    W1 = jnp.stack([l1[0], l2[0]]).astype(jnp.bfloat16)      # (2, Ci, C)
    B1 = jnp.stack([l1[1], l2[1]])[..., None]                # (2, Ci, 1) f32
    W2 = jnp.stack([l1[2], l2[2]]).astype(jnp.bfloat16)      # (2, C, Ci)
    B2 = jnp.stack([l1[3], l2[3]])[..., None]                # (2, C, 1)  f32

    # Stage-1 global attention: GAP over true spatial extent + tiny MLP (XLA).
    mean_xa = jnp.mean(x, axis=(2, 3)) + jnp.mean(residual, axis=(2, 3))   # (N, C)
    xg1 = _global_mlp(mean_xa, gw1, gb1, gw2, gb2)[..., None]              # (N, C, 1)

    # Spatial tiling: lane-dense tiles, capped so a (C, thw) f32 block ~<= 1 MiB.
    cap = max(128, ((1 << 20) // (4 * c)) // 128 * 128)
    thw = min(_round_up(hw, 128), cap, 4096)
    hwp = _round_up(hw, thw)
    t = hwp // thw

    pad = ((0, 0), (0, 0), (0, hwp - hw))
    x3 = jnp.pad(x.reshape(n, c, hw), pad)          # zero pad -> xi/out pad = 0
    r3 = jnp.pad(residual.reshape(n, c, hw), pad)

    img_spec = pl.BlockSpec((1, c, thw), lambda i, j: (i, 0, j))
    vec_spec = pl.BlockSpec((1, c, 1), lambda i, j: (i, 0, 0))
    w_specs = [pl.BlockSpec((2, ci, c), lambda i, j: (0, 0, 0)),
               pl.BlockSpec((2, ci, 1), lambda i, j: (0, 0, 0)),
               pl.BlockSpec((2, c, ci), lambda i, j: (0, 0, 0)),
               pl.BlockSpec((2, c, 1), lambda i, j: (0, 0, 0))]

    # Pass 1: per-image sum(xi) accumulated across spatial tiles.
    sums = pl.pallas_call(
        _iaff_sum_kernel,
        out_shape=jax.ShapeDtypeStruct((n, c, 1), jnp.float32),
        grid=(n, t),
        in_specs=[img_spec, img_spec] + w_specs + [vec_spec],
        out_specs=vec_spec,
        compiler_params=pltpu.CompilerParams(
            dimension_semantics=("parallel", "arbitrary")),
    )(x3, r3, W1, B1, W2, B2, xg1)

    # Stage-2 global attention from the true spatial mean of xi (XLA, tiny).
    xg2 = _global_mlp(sums[..., 0] / float(hw), gw1, gb1, gw2, gb2)[..., None]

    # Pass 2: recompute xi per tile, stage-2 attention, final blend.
    out3 = pl.pallas_call(
        _iaff_out_kernel,
        out_shape=jax.ShapeDtypeStruct((n, c, hwp), x.dtype),
        grid=(n, t),
        in_specs=[img_spec, img_spec] + w_specs + [vec_spec, vec_spec],
        out_specs=img_spec,
        compiler_params=pltpu.CompilerParams(
            dimension_semantics=("parallel", "parallel")),
    )(x3, r3, W1, B1, W2, B2, xg1, xg2)

    return out3[:, :, :hw].reshape(n, c, h, w)


# ----------------------------- test scaffolding -----------------------------

def _init_branch(key, c, ci, dtype=jnp.float32):
    ks = jax.random.split(key, 12)

    def nrm(k, shape, scale):
        return scale * jax.random.normal(k, shape, dtype)

    def uni(k, shape):
        return jax.random.uniform(k, shape, dtype, 0.5, 1.5)

    return dict(
        w1=nrm(ks[0], (ci, c), 1.0 / (c ** 0.5)),
        b1=nrm(ks[1], (ci,), 0.1),
        bn1_gamma=uni(ks[2], (ci,)), bn1_beta=nrm(ks[3], (ci,), 0.1),
        bn1_mean=nrm(ks[4], (ci,), 0.1), bn1_var=uni(ks[5], (ci,)),
        w2=nrm(ks[6], (c, ci), 1.0 / (ci ** 0.5)),
        b2=nrm(ks[7], (c,), 0.1),
        bn2_gamma=uni(ks[8], (c,)), bn2_beta=nrm(ks[9], (c,), 0.1),
        bn2_mean=nrm(ks[10], (c,), 0.1), bn2_var=uni(ks[11], (c,)),
    )


def init_iaff_params(key, channels=64, r=4, dtype=jnp.float32):
    ci = max(channels // r, 1)
    k1, k2, k3 = jax.random.split(key, 3)
    return dict(
        local_att=_init_branch(k1, channels, ci, dtype),
        global_att=_init_branch(k2, channels, ci, dtype),
        local_att2=_init_branch(k3, channels, ci, dtype),
        # global_att2 is declared in the PyTorch module but never used in forward().
    )


def _reference_iaff(x, residual, params, eps=_BN_EPS):
    """Pure-JAX f32 NCHW reference with explicit 1x1 conv + eval-mode BN (unfused)."""

    def conv1x1(z, w, b):
        return jnp.einsum("oc,nchw->nohw", w, z) + b[None, :, None, None]

    def bn(z, p, idx):
        g = p[f"bn{idx}_gamma"][None, :, None, None]
        bt = p[f"bn{idx}_beta"][None, :, None, None]
        m = p[f"bn{idx}_mean"][None, :, None, None]
        v = p[f"bn{idx}_var"][None, :, None, None]
        return (z - m) * (g / jnp.sqrt(v + eps)) + bt

    def branch(z, p):
        h = bn(conv1x1(z, p["w1"], p["b1"]), p, 1)
        h = jnp.maximum(h, 0.0)
        return bn(conv1x1(h, p["w2"], p["b2"]), p, 2)

    def global_branch(z, p):
        return branch(jnp.mean(z, axis=(2, 3), keepdims=True), p)

    xa = x + residual
    wei = jax.nn.sigmoid(branch(xa, params["local_att"])
                         + global_branch(xa, params["global_att"]))
    xi = x * wei + residual * (1.0 - wei)
    wei2 = jax.nn.sigmoid(branch(xi, params["local_att2"])
                          + global_branch(xi, params["global_att"]))
    return x * wei2 + residual * (1.0 - wei2)


if __name__ == "__main__":
    key = jax.random.PRNGKey(0)
    kx, kr, kp = jax.random.split(key, 3)

    channels, r = 64, 4            # PyTorch defaults (inter_channels = 16)
    n, h, w = 2, 16, 16            # small NCHW test shape

    x = jax.random.normal(kx, (n, channels, h, w), dtype=jnp.float32)
    residual = jax.random.normal(kr, (n, channels, h, w), dtype=jnp.float32)
    params = init_iaff_params(kp, channels, r)

    out = jax.block_until_ready(iaff_forward(x, residual, params))
    ref = jax.block_until_ready(_reference_iaff(x, residual, params))

    assert out.shape == x.shape and out.dtype == x.dtype
    # Loose tolerance: the kernel intentionally uses bf16 MXU operands and an
    # approx-reciprocal sigmoid; a broken kernel would be off by O(1).
    max_err = float(jnp.max(jnp.abs(out - ref)))
    assert max_err < 1e-1, f"max abs err vs reference: {max_err}"
    print("KERNEL_OK")
</pallas_src>

<mosaic_0001>
module attributes {stable_mosaic.version = 11 : i64} {
  func.func @_iaff_sum_kernel(%arg0: i32, %arg1: i32, %arg2: memref<1x64x256xf32, #tpu.memory_space<vmem>>, %arg3: memref<1x64x256xf32, #tpu.memory_space<vmem>>, %arg4: memref<2x16x64xbf16, #tpu.memory_space<vmem>>, %arg5: memref<2x16x1xf32, #tpu.memory_space<vmem>>, %arg6: memref<2x64x16xbf16, #tpu.memory_space<vmem>>, %arg7: memref<2x64x1xf32, #tpu.memory_space<vmem>>, %arg8: memref<1x64x1xf32, #tpu.memory_space<vmem>>, %arg9: memref<1x64x1xf32, #tpu.memory_space<vmem>>) attributes {dimension_semantics = [#tpu.dimension_semantics<parallel>, #tpu.dimension_semantics<arbitrary>], iteration_bounds = array<i64: 2, 1>, scalar_prefetch = 0 : i64, scratch_operands = 0 : i64, tpu.core_type = #tpu.core_type<tc>, window_params = [{transform_indices = @transform_0, window_bounds = array<i64: 1, 64, 256>}, {transform_indices = @transform_1, window_bounds = array<i64: 1, 64, 256>}, {pipeline_mode = #tpu.pipeline_mode<synchronous>, transform_indices = @transform_2, window_bounds = array<i64: 2, 16, 64>}, {pipeline_mode = #tpu.pipeline_mode<synchronous>, transform_indices = @transform_3, window_bounds = array<i64: 2, 16, 1>}, {pipeline_mode = #tpu.pipeline_mode<synchronous>, transform_indices = @transform_4, window_bounds = array<i64: 2, 64, 16>}, {pipeline_mode = #tpu.pipeline_mode<synchronous>, transform_indices = @transform_5, window_bounds = array<i64: 2, 64, 1>}, {transform_indices = @transform_6, window_bounds = array<i64: 1, 64, 1>}, {transform_indices = @transform_7, window_bounds = array<i64: 1, 64, 1>}]} {
    %c0 = arith.constant 0 : index
    %c0_0 = arith.constant 0 : index
    %c0_1 = arith.constant 0 : index
    %0 = vector.load %arg2[%c0, %c0_0, %c0_1] : memref<1x64x256xf32, #tpu.memory_space<vmem>>, vector<1x64x256xf32>
    %1 = vector.shape_cast %0 : vector<1x64x256xf32> to vector<64x256xf32>
    %c0_2 = arith.constant 0 : index
    %c0_3 = arith.constant 0 : index
    %c0_4 = arith.constant 0 : index
    %2 = vector.load %arg3[%c0_2, %c0_3, %c0_4] : memref<1x64x256xf32, #tpu.memory_space<vmem>>, vector<1x64x256xf32>
    %3 = vector.shape_cast %2 : vector<1x64x256xf32> to vector<64x256xf32>
    %4 = arith.subf %1, %3 : vector<64x256xf32>
    %5 = arith.addf %1, %3 : vector<64x256xf32>
    %c0_5 = arith.constant 0 : index
    %c0_6 = arith.constant 0 : index
    %c0_7 = arith.constant 0 : index
    %6 = vector.load %arg4[%c0_5, %c0_6, %c0_7] : memref<2x16x64xbf16, #tpu.memory_space<vmem>>, vector<1x16x64xbf16>
    %7 = vector.shape_cast %6 : vector<1x16x64xbf16> to vector<16x64xbf16>
    %c0_8 = arith.constant 0 : index
    %c0_9 = arith.constant 0 : index
    %c0_10 = arith.constant 0 : index
    %8 = vector.load %arg5[%c0_8, %c0_9, %c0_10] : memref<2x16x1xf32, #tpu.memory_space<vmem>>, vector<1x16x1xf32>
    %9 = vector.shape_cast %8 : vector<1x16x1xf32> to vector<16x1xf32>
    %c0_11 = arith.constant 0 : index
    %c0_12 = arith.constant 0 : index
    %c0_13 = arith.constant 0 : index
    %10 = vector.load %arg6[%c0_11, %c0_12, %c0_13] : memref<2x64x16xbf16, #tpu.memory_space<vmem>>, vector<1x64x16xbf16>
    %11 = vector.shape_cast %10 : vector<1x64x16xbf16> to vector<64x16xbf16>
    %c0_14 = arith.constant 0 : index
    %c0_15 = arith.constant 0 : index
    %c0_16 = arith.constant 0 : index
    %12 = vector.load %arg7[%c0_14, %c0_15, %c0_16] : memref<2x64x1xf32, #tpu.memory_space<vmem>>, vector<1x64x1xf32>
    %13 = vector.shape_cast %12 : vector<1x64x1xf32> to vector<64x1xf32>
    %c0_17 = arith.constant 0 : index
    %c0_18 = arith.constant 0 : index
    %c0_19 = arith.constant 0 : index
    %14 = vector.load %arg8[%c0_17, %c0_18, %c0_19] : memref<1x64x1xf32, #tpu.memory_space<vmem>>, vector<1x64x1xf32>
    %15 = vector.shape_cast %14 : vector<1x64x1xf32> to vector<64x1xf32>
    %16 = arith.truncf %5 : vector<64x256xf32> to vector<64x256xbf16>
    %cst = arith.constant dense<0.000000e+00> : vector<16x256xf32>
    %17 = tpu.matmul %7, %16, %cst {dimension_numbers = #tpu.dot_dimension_numbers<[1], [0], [0], [1], [0, 0, 1, 1], [], []>} : vector<16x64xbf16>, vector<64x256xbf16>, vector<16x256xf32> -> vector<16x256xf32>
    %18 = vector.broadcast %9 : vector<16x1xf32> to vector<16x256xf32>
    %19 = arith.addf %17, %18 : vector<16x256xf32>
    %cst_20 = arith.constant 0.000000e+00 : f32
    %20 = vector.broadcast %cst_20 : f32 to vector<16x256xf32>
    %21 = arith.maximumf %19, %20 : vector<16x256xf32>
    %22 = arith.truncf %21 : vector<16x256xf32> to vector<16x256xbf16>
    %cst_21 = arith.constant dense<0.000000e+00> : vector<64x256xf32>
    %23 = tpu.matmul %11, %22, %cst_21 {dimension_numbers = #tpu.dot_dimension_numbers<[1], [0], [0], [1], [0, 0, 1, 1], [], []>} : vector<64x16xbf16>, vector<16x256xbf16>, vector<64x256xf32> -> vector<64x256xf32>
    %24 = vector.broadcast %13 : vector<64x1xf32> to vector<64x256xf32>
    %25 = arith.addf %23, %24 : vector<64x256xf32>
    %26 = vector.broadcast %15 : vector<64x1xf32> to vector<64x256xf32>
    %27 = arith.addf %25, %26 : vector<64x256xf32>
    %cst_22 = arith.constant 0.000000e+00 : f32
    %28 = vector.broadcast %cst_22 : f32 to vector<64x256xf32>
    %29 = arith.subf %28, %27 : vector<64x256xf32>
    %30 = math.exp %29 : vector<64x256xf32>
    %cst_23 = arith.constant 1.000000e+00 : f32
    %31 = vector.broadcast %cst_23 : f32 to vector<64x256xf32>
    %32 = arith.addf %31, %30 : vector<64x256xf32>
    %33 = tpu.reciprocal %32 {approx = true} : vector<64x256xf32> -> vector<64x256xf32>
    %34 = arith.mulf %4, %33 : vector<64x256xf32>
    %35 = arith.addf %3, %34 : vector<64x256xf32>
    %c0_i32 = arith.constant 0 : i32
    %36 = arith.cmpi eq, %arg1, %c0_i32 : i32
    %37 = arith.extui %36 : i1 to i32
    %c0_i32_24 = arith.constant 0 : i32
    %38 = arith.cmpi ne, %37, %c0_i32_24 : i32
    scf.if %38 {
      %cst_32 = arith.constant 0.000000e+00 : f32
      %47 = vector.broadcast %cst_32 : f32 to vector<64x1xf32>
      %c0_33 = arith.constant 0 : index
      %c0_34 = arith.constant 0 : index
      %c0_35 = arith.constant 0 : index
      %48 = vector.load %arg9[%c0_33, %c0_34, %c0_35] : memref<1x64x1xf32, #tpu.memory_space<vmem>>, vector<1x64x1xf32>
      %49 = vector.shape_cast %48 : vector<1x64x1xf32> to vector<64x1xf32>
      %50 = vector.shape_cast %47 : vector<64x1xf32> to vector<1x64x1xf32>
      tpu.vector_store %arg9[%c0_33, %c0_34, %c0_35], %50 {strides = array<i32>} : memref<1x64x1xf32, #tpu.memory_space<vmem>>, vector<1x64x1xf32>,
    } else {
    }
    %c0_25 = arith.constant 0 : index
    %c0_26 = arith.constant 0 : index
    %c0_27 = arith.constant 0 : index
    %39 = vector.load %arg9[%c0_25, %c0_26, %c0_27] : memref<1x64x1xf32, #tpu.memory_space<vmem>>, vector<1x64x1xf32>
    %40 = vector.shape_cast %39 : vector<1x64x1xf32> to vector<64x1xf32>
    %cst_28 = arith.constant dense<0.000000e+00> : vector<64xf32>
    %41 = vector.multi_reduction <add>, %35, %cst_28 [1] : vector<64x256xf32> to vector<64xf32>
    %42 = vector.shape_cast %41 : vector<64xf32> to vector<64x1xf32>
    %43 = arith.addf %40, %42 : vector<64x1xf32>
    %c0_29 = arith.constant 0 : index
    %c0_30 = arith.constant 0 : index
    %c0_31 = arith.constant 0 : index
    %44 = vector.load %arg9[%c0_29, %c0_30, %c0_31] : memref<1x64x1xf32, #tpu.memory_space<vmem>>, vector<1x64x1xf32>
    %45 = vector.shape_cast %44 : vector<1x64x1xf32> to vector<64x1xf32>
    %46 = vector.shape_cast %43 : vector<64x1xf32> to vector<1x64x1xf32>
    tpu.vector_store %arg9[%c0_29, %c0_30, %c0_31], %46 {strides = array<i32>} : memref<1x64x1xf32, #tpu.memory_space<vmem>>, vector<1x64x1xf32>,
    return
  }
  func.func @transform_0(%arg0: i32, %arg1: i32) -> (i32, i32, i32) {
    %c0_i32 = arith.constant 0 : i32
    %c0_i32_0 = arith.constant 0 : i32
    return %arg0, %c0_i32, %arg1 : i32, i32, i32
  }
  func.func @transform_1(%arg0: i32, %arg1: i32) -> (i32, i32, i32) {
    %c0_i32 = arith.constant 0 : i32
    %c0_i32_0 = arith.constant 0 : i32
    return %arg0, %c0_i32, %arg1 : i32, i32, i32
  }
  func.func @transform_2(%arg0: i32, %arg1: i32) -> (i32, i32, i32) {
    %c0_i32 = arith.constant 0 : i32
    %c0_i32_0 = arith.constant 0 : i32
    %c0_i32_1 = arith.constant 0 : i32
    %c0_i32_2 = arith.constant 0 : i32
    return %c0_i32, %c0_i32_0, %c0_i32_1 : i32, i32, i32
  }
  func.func @transform_3(%arg0: i32, %arg1: i32) -> (i32, i32, i32) {
    %c0_i32 = arith.constant 0 : i32
    %c0_i32_0 = arith.constant 0 : i32
    %c0_i32_1 = arith.constant 0 : i32
    %c0_i32_2 = arith.constant 0 : i32
    return %c0_i32, %c0_i32_0, %c0_i32_1 : i32, i32, i32
  }
  func.func @transform_4(%arg0: i32, %arg1: i32) -> (i32, i32, i32) {
    %c0_i32 = arith.constant 0 : i32
    %c0_i32_0 = arith.constant 0 : i32
    %c0_i32_1 = arith.constant 0 : i32
    %c0_i32_2 = arith.constant 0 : i32
    return %c0_i32, %c0_i32_0, %c0_i32_1 : i32, i32, i32
  }
  func.func @transform_5(%arg0: i32, %arg1: i32) -> (i32, i32, i32) {
    %c0_i32 = arith.constant 0 : i32
    %c0_i32_0 = arith.constant 0 : i32
    %c0_i32_1 = arith.constant 0 : i32
    %c0_i32_2 = arith.constant 0 : i32
    return %c0_i32, %c0_i32_0, %c0_i32_1 : i32, i32, i32
  }
  func.func @transform_6(%arg0: i32, %arg1: i32) -> (i32, i32, i32) {
    %c0_i32 = arith.constant 0 : i32
    %c0_i32_0 = arith.constant 0 : i32
    %c0_i32_1 = arith.constant 0 : i32
    return %arg0, %c0_i32, %c0_i32_0 : i32, i32, i32
  }
  func.func @transform_7(%arg0: i32, %arg1: i32) -> (i32, i32, i32) {
    %c0_i32 = arith.constant 0 : i32
    %c0_i32_0 = arith.constant 0 : i32
    %c0_i32_1 = arith.constant 0 : i32
    return %arg0, %c0_i32, %c0_i32_0 : i32, i32, i32
  }
}

module attributes {stable_mosaic.version = 11 : i64} {
  func.func @_iaff_out_kernel(%arg0: i32, %arg1: i32, %arg2: memref<1x64x256xf32, #tpu.memory_space<vmem>>, %arg3: memref<1x64x256xf32, #tpu.memory_space<vmem>>, %arg4: memref<2x16x64xbf16, #tpu.memory_space<vmem>>, %arg5: memref<2x16x1xf32, #tpu.memory_space<vmem>>, %arg6: memref<2x64x16xbf16, #tpu.memory_space<vmem>>, %arg7: memref<2x64x1xf32, #tpu.memory_space<vmem>>, %arg8: memref<1x64x1xf32, #tpu.memory_space<vmem>>, %arg9: memref<1x64x1xf32, #tpu.memory_space<vmem>>, %arg10: memref<1x64x256xf32, #tpu.memory_space<vmem>>) attributes {dimension_semantics = [#tpu.dimension_semantics<parallel>, #tpu.dimension_semantics<parallel>], iteration_bounds = array<i64: 2, 1>, scalar_prefetch = 0 : i64, scratch_operands = 0 : i64, tpu.core_type = #tpu.core_type<tc>, window_params = [{transform_indices = @transform_0, window_bounds = array<i64: 1, 64, 256>}, {transform_indices = @transform_1, window_bounds = array<i64: 1, 64, 256>}, {pipeline_mode = #tpu.pipeline_mode<synchronous>, transform_indices = @transform_2, window_bounds = array<i64: 2, 16, 64>}, {pipeline_mode = #tpu.pipeline_mode<synchronous>, transform_indices = @transform_3, window_bounds = array<i64: 2, 16, 1>}, {pipeline_mode = #tpu.pipeline_mode<synchronous>, transform_indices = @transform_4, window_bounds = array<i64: 2, 64, 16>}, {pipeline_mode = #tpu.pipeline_mode<synchronous>, transform_indices = @transform_5, window_bounds = array<i64: 2, 64, 1>}, {transform_indices = @transform_6, window_bounds = array<i64: 1, 64, 1>}, {transform_indices = @transform_7, window_bounds = array<i64: 1, 64, 1>}, {transform_indices = @transform_8, window_bounds = array<i64: 1, 64, 256>}]} {
    %c0 = arith.constant 0 : index
    %c0_0 = arith.constant 0 : index
    %c0_1 = arith.constant 0 : index
    %0 = vector.load %arg2[%c0, %c0_0, %c0_1] : memref<1x64x256xf32, #tpu.memory_space<vmem>>, vector<1x64x256xf32>
    %1 = vector.shape_cast %0 : vector<1x64x256xf32> to vector<64x256xf32>
    %c0_2 = arith.constant 0 : index
    %c0_3 = arith.constant 0 : index
    %c0_4 = arith.constant 0 : index
    %2 = vector.load %arg3[%c0_2, %c0_3, %c0_4] : memref<1x64x256xf32, #tpu.memory_space<vmem>>, vector<1x64x256xf32>
    %3 = vector.shape_cast %2 : vector<1x64x256xf32> to vector<64x256xf32>
    %4 = arith.subf %1, %3 : vector<64x256xf32>
    %5 = arith.addf %1, %3 : vector<64x256xf32>
    %c0_5 = arith.constant 0 : index
    %c0_6 = arith.constant 0 : index
    %c0_7 = arith.constant 0 : index
    %6 = vector.load %arg4[%c0_5, %c0_6, %c0_7] : memref<2x16x64xbf16, #tpu.memory_space<vmem>>, vector<1x16x64xbf16>
    %7 = vector.shape_cast %6 : vector<1x16x64xbf16> to vector<16x64xbf16>
    %c0_8 = arith.constant 0 : index
    %c0_9 = arith.constant 0 : index
    %c0_10 = arith.constant 0 : index
    %8 = vector.load %arg5[%c0_8, %c0_9, %c0_10] : memref<2x16x1xf32, #tpu.memory_space<vmem>>, vector<1x16x1xf32>
    %9 = vector.shape_cast %8 : vector<1x16x1xf32> to vector<16x1xf32>
    %c0_11 = arith.constant 0 : index
    %c0_12 = arith.constant 0 : index
    %c0_13 = arith.constant 0 : index
    %10 = vector.load %arg6[%c0_11, %c0_12, %c0_13] : memref<2x64x16xbf16, #tpu.memory_space<vmem>>, vector<1x64x16xbf16>
    %11 = vector.shape_cast %10 : vector<1x64x16xbf16> to vector<64x16xbf16>
    %c0_14 = arith.constant 0 : index
    %c0_15 = arith.constant 0 : index
    %c0_16 = arith.constant 0 : index
    %12 = vector.load %arg7[%c0_14, %c0_15, %c0_16] : memref<2x64x1xf32, #tpu.memory_space<vmem>>, vector<1x64x1xf32>
    %13 = vector.shape_cast %12 : vector<1x64x1xf32> to vector<64x1xf32>
    %c0_17 = arith.constant 0 : index
    %c0_18 = arith.constant 0 : index
    %c0_19 = arith.constant 0 : index
    %14 = vector.load %arg8[%c0_17, %c0_18, %c0_19] : memref<1x64x1xf32, #tpu.memory_space<vmem>>, vector<1x64x1xf32>
    %15 = vector.shape_cast %14 : vector<1x64x1xf32> to vector<64x1xf32>
    %16 = arith.truncf %5 : vector<64x256xf32> to vector<64x256xbf16>
    %cst = arith.constant dense<0.000000e+00> : vector<16x256xf32>
    %17 = tpu.matmul %7, %16, %cst {dimension_numbers = #tpu.dot_dimension_numbers<[1], [0], [0], [1], [0, 0, 1, 1], [], []>} : vector<16x64xbf16>, vector<64x256xbf16>, vector<16x256xf32> -> vector<16x256xf32>
    %18 = vector.broadcast %9 : vector<16x1xf32> to vector<16x256xf32>
    %19 = arith.addf %17, %18 : vector<16x256xf32>
    %cst_20 = arith.constant 0.000000e+00 : f32
    %20 = vector.broadcast %cst_20 : f32 to vector<16x256xf32>
    %21 = arith.maximumf %19, %20 : vector<16x256xf32>
    %22 = arith.truncf %21 : vector<16x256xf32> to vector<16x256xbf16>
    %cst_21 = arith.constant dense<0.000000e+00> : vector<64x256xf32>
    %23 = tpu.matmul %11, %22, %cst_21 {dimension_numbers = #tpu.dot_dimension_numbers<[1], [0], [0], [1], [0, 0, 1, 1], [], []>} : vector<64x16xbf16>, vector<16x256xbf16>, vector<64x256xf32> -> vector<64x256xf32>
    %24 = vector.broadcast %13 : vector<64x1xf32> to vector<64x256xf32>
    %25 = arith.addf %23, %24 : vector<64x256xf32>
    %26 = vector.broadcast %15 : vector<64x1xf32> to vector<64x256xf32>
    %27 = arith.addf %25, %26 : vector<64x256xf32>
    %cst_22 = arith.constant 0.000000e+00 : f32
    %28 = vector.broadcast %cst_22 : f32 to vector<64x256xf32>
    %29 = arith.subf %28, %27 : vector<64x256xf32>
    %30 = math.exp %29 : vector<64x256xf32>
    %cst_23 = arith.constant 1.000000e+00 : f32
    %31 = vector.broadcast %cst_23 : f32 to vector<64x256xf32>
    %32 = arith.addf %31, %30 : vector<64x256xf32>
    %33 = tpu.reciprocal %32 {approx = true} : vector<64x256xf32> -> vector<64x256xf32>
    %34 = arith.mulf %4, %33 : vector<64x256xf32>
    %35 = arith.addf %3, %34 : vector<64x256xf32>
    %c1 = arith.constant 1 : index
    %c0_24 = arith.constant 0 : index
    %c0_25 = arith.constant 0 : index
    %36 = vector.load %arg4[%c1, %c0_24, %c0_25] : memref<2x16x64xbf16, #tpu.memory_space<vmem>>, vector<1x16x64xbf16>
    %37 = vector.shape_cast %36 : vector<1x16x64xbf16> to vector<16x64xbf16>
    %c1_26 = arith.constant 1 : index
    %c0_27 = arith.constant 0 : index
    %c0_28 = arith.constant 0 : index
    %38 = vector.load %arg5[%c1_26, %c0_27, %c0_28] : memref<2x16x1xf32, #tpu.memory_space<vmem>>, vector<1x16x1xf32>
    %39 = vector.shape_cast %38 : vector<1x16x1xf32> to vector<16x1xf32>
    %c1_29 = arith.constant 1 : index
    %c0_30 = arith.constant 0 : index
    %c0_31 = arith.constant 0 : index
    %40 = vector.load %arg6[%c1_29, %c0_30, %c0_31] : memref<2x64x16xbf16, #tpu.memory_space<vmem>>, vector<1x64x16xbf16>
    %41 = vector.shape_cast %40 : vector<1x64x16xbf16> to vector<64x16xbf16>
    %c1_32 = arith.constant 1 : index
    %c0_33 = arith.constant 0 : index
    %c0_34 = arith.constant 0 : index
    %42 = vector.load %arg7[%c1_32, %c0_33, %c0_34] : memref<2x64x1xf32, #tpu.memory_space<vmem>>, vector<1x64x1xf32>
    %43 = vector.shape_cast %42 : vector<1x64x1xf32> to vector<64x1xf32>
    %c0_35 = arith.constant 0 : index
    %c0_36 = arith.constant 0 : index
    %c0_37 = arith.constant 0 : index
    %44 = vector.load %arg9[%c0_35, %c0_36, %c0_37] : memref<1x64x1xf32, #tpu.memory_space<vmem>>, vector<1x64x1xf32>
    %45 = vector.shape_cast %44 : vector<1x64x1xf32> to vector<64x1xf32>
    %46 = arith.truncf %35 : vector<64x256xf32> to vector<64x256xbf16>
    %cst_38 = arith.constant dense<0.000000e+00> : vector<16x256xf32>
    %47 = tpu.matmul %37, %46, %cst_38 {dimension_numbers = #tpu.dot_dimension_numbers<[1], [0], [0], [1], [0, 0, 1, 1], [], []>} : vector<16x64xbf16>, vector<64x256xbf16>, vector<16x256xf32> -> vector<16x256xf32>
    %48 = vector.broadcast %39 : vector<16x1xf32> to vector<16x256xf32>
    %49 = arith.addf %47, %48 : vector<16x256xf32>
    %cst_39 = arith.constant 0.000000e+00 : f32
    %50 = vector.broadcast %cst_39 : f32 to vector<16x256xf32>
    %51 = arith.maximumf %49, %50 : vector<16x256xf32>
    %52 = arith.truncf %51 : vector<16x256xf32> to vector<16x256xbf16>
    %cst_40 = arith.constant dense<0.000000e+00> : vector<64x256xf32>
    %53 = tpu.matmul %41, %52, %cst_40 {dimension_numbers = #tpu.dot_dimension_numbers<[1], [0], [0], [1], [0, 0, 1, 1], [], []>} : vector<64x16xbf16>, vector<16x256xbf16>, vector<64x256xf32> -> vector<64x256xf32>
    %54 = vector.broadcast %43 : vector<64x1xf32> to vector<64x256xf32>
    %55 = arith.addf %53, %54 : vector<64x256xf32>
    %56 = vector.broadcast %45 : vector<64x1xf32> to vector<64x256xf32>
    %57 = arith.addf %55, %56 : vector<64x256xf32>
    %cst_41 = arith.constant 0.000000e+00 : f32
    %58 = vector.broadcast %cst_41 : f32 to vector<64x256xf32>
    %59 = arith.subf %58, %57 : vector<64x256xf32>
    %60 = math.exp %59 : vector<64x256xf32>
    %cst_42 = arith.constant 1.000000e+00 : f32
    %61 = vector.broadcast %cst_42 : f32 to vector<64x256xf32>
    %62 = arith.addf %61, %60 : vector<64x256xf32>
    %63 = tpu.reciprocal %62 {approx = true} : vector<64x256xf32> -> vector<64x256xf32>
    %64 = arith.mulf %4, %63 : vector<64x256xf32>
    %65 = arith.addf %3, %64 : vector<64x256xf32>
    %c0_43 = arith.constant 0 : index
    %c0_44 = arith.constant 0 : index
    %c0_45 = arith.constant 0 : index
    %66 = vector.load %arg10[%c0_43, %c0_44, %c0_45] : memref<1x64x256xf32, #tpu.memory_space<vmem>>, vector<1x64x256xf32>
    %67 = vector.shape_cast %66 : vector<1x64x256xf32> to vector<64x256xf32>
    %68 = vector.shape_cast %65 : vector<64x256xf32> to vector<1x64x256xf32>
    tpu.vector_store %arg10[%c0_43, %c0_44, %c0_45], %68 {strides = array<i32>} : memref<1x64x256xf32, #tpu.memory_space<vmem>>, vector<1x64x256xf32>,
    return
  }
  func.func @transform_0(%arg0: i32, %arg1: i32) -> (i32, i32, i32) {
    %c0_i32 = arith.constant 0 : i32
    %c0_i32_0 = arith.constant 0 : i32
    return %arg0, %c0_i32, %arg1 : i32, i32, i32
  }
  func.func @transform_1(%arg0: i32, %arg1: i32) -> (i32, i32, i32) {
    %c0_i32 = arith.constant 0 : i32
    %c0_i32_0 = arith.constant 0 : i32
    return %arg0, %c0_i32, %arg1 : i32, i32, i32
  }
  func.func @transform_2(%arg0: i32, %arg1: i32) -> (i32, i32, i32) {
    %c0_i32 = arith.constant 0 : i32
    %c0_i32_0 = arith.constant 0 : i32
    %c0_i32_1 = arith.constant 0 : i32
    %c0_i32_2 = arith.constant 0 : i32
    return %c0_i32, %c0_i32_0, %c0_i32_1 : i32, i32, i32
  }
  func.func @transform_3(%arg0: i32, %arg1: i32) -> (i32, i32, i32) {
    %c0_i32 = arith.constant 0 : i32
    %c0_i32_0 = arith.constant 0 : i32
    %c0_i32_1 = arith.constant 0 : i32
    %c0_i32_2 = arith.constant 0 : i32
    return %c0_i32, %c0_i32_0, %c0_i32_1 : i32, i32, i32
  }
  func.func @transform_4(%arg0: i32, %arg1: i32) -> (i32, i32, i32) {
    %c0_i32 = arith.constant 0 : i32
    %c0_i32_0 = arith.constant 0 : i32
    %c0_i32_1 = arith.constant 0 : i32
    %c0_i32_2 = arith.constant 0 : i32
    return %c0_i32, %c0_i32_0, %c0_i32_1 : i32, i32, i32
  }
  func.func @transform_5(%arg0: i32, %arg1: i32) -> (i32, i32, i32) {
    %c0_i32 = arith.constant 0 : i32
    %c0_i32_0 = arith.constant 0 : i32
    %c0_i32_1 = arith.constant 0 : i32
    %c0_i32_2 = arith.constant 0 : i32
    return %c0_i32, %c0_i32_0, %c0_i32_1 : i32, i32, i32
  }
  func.func @transform_6(%arg0: i32, %arg1: i32) -> (i32, i32, i32) {
    %c0_i32 = arith.constant 0 : i32
    %c0_i32_0 = arith.constant 0 : i32
    %c0_i32_1 = arith.constant 0 : i32
    return %arg0, %c0_i32, %c0_i32_0 : i32, i32, i32
  }
  func.func @transform_7(%arg0: i32, %arg1: i32) -> (i32, i32, i32) {
    %c0_i32 = arith.constant 0 : i32
    %c0_i32_0 = arith.constant 0 : i32
    %c0_i32_1 = arith.constant 0 : i32
    return %arg0, %c0_i32, %c0_i32_0 : i32, i32, i32
  }
  func.func @transform_8(%arg0: i32, %arg1: i32) -> (i32, i32, i32) {
    %c0_i32 = arith.constant 0 : i32
    %c0_i32_0 = arith.constant 0 : i32
    return %arg0, %c0_i32, %arg1 : i32, i32, i32
  }
}

</mosaic_0001>

<bundles_post_ra>
// kernel: iaff_forward.2
= control target key start
LH: loop header
LB: loop body
LE: loop exit
PB: predicated region body
PF: predicated region fallthrough
CT: control target
= control target key end

     0   :  { %s1199_s24 = smov 0   ;;  %s1201_s25 = smov 0   ;;  %s1542_s0 = inlined_call_operand.vmem [shape: f32[2,64,256], index: 0, kind: input, shape index: {}]   ;;  %s1543_s1 = inlined_call_operand.vmem [shape: f32[2,64,256], index: 1, kind: input, shape index: {}]   ;;  %s1544_s2 = inlined_call_operand.vmem [shape: bf16[2,16,64], index: 2, kind: input, shape index: {}]   ;;  %s1545_s3 = inlined_call_operand.vmem [shape: f32[2,16,1], index: 3, kind: input, shape index: {}]   ;;  %s1546_s4 = inlined_call_operand.vmem [shape: bf16[2,64,16], index: 4, kind: input, shape index: {}]   ;;  %s1547_s5 = inlined_call_operand.vmem [shape: f32[2,64,1], index: 5, kind: input, shape index: {}]   ;;  %s1548_s6 = inlined_call_operand.vmem [shape: f32[2,64,1], index: 6, kind: input, shape index: {}]   ;;  %s1549_s7 = inlined_call_operand.vmem [shape: f32[2,64,1], index: 7, kind: output, shape index: {}]  }
   0x1   :  { %s1203_s26 = smov 0  }
   0x2 LB: > { %s29_s27 = sadd.s32 1, %s1151_s25  ;;  %p1011_p0 = scmp.ge.s32.totalorder %s1155_s26, 1  ;;  %s1155_s26 = sphi %s1203_s26, %s17_s26   ;;  %s1151_s25 = sphi %s1201_s25, %s1551_s25   ;;  %s1147_s24 = sphi %s1199_s24, %s1550_s24  }
   0x3   : > { %p31_p1 = scmp.ge.s32.totalorder %s29_s27, 2  ;;  %p283_p2 = scmp.lt.s32.totalorder %s1155_s26, 3 }
   0x5   : > { %s1553_s27 = smov (%p31_p1, %s29_s27), 0  ;;  %p284_p3 = pnand %p1011_p0, %p283_p2 }
   0x6   : > { %p334_p4 = scmp.lt.s32.totalorder (!%p284_p3), %s1147_s24, 1  ;;  %v1157_v0 = vmov (!%p284_p3), 0   ;;  %v430_v1 = vld [vmem:[%s1545_s3] sm:$0xff] (!%p284_p3)  ;;  %v431_v2 = vld [vmem:[%s1545_s3 + $0x8] sm:$0xff] (!%p284_p3)  ;;  %v442_v3 = vld [vmem:[%s1547_s5 + $0x10] sm:$0xff] (!%p284_p3)  ;;  %vm479_vm0 = vcmask (!%p284_p3), 523264  }
   0x7   : > { %287 = sbr.rel (%p284_p3) target bundleno = 687 (0x2af), region = 48  ;;  %515 = vmatprep.mubr.bf16.mxu0 (!%p284_p3), %v1157_v0  ;;  %1062 = vset.pattern.permute.xlu0 (!%p284_p3), %v1157_v0  ;;  %v444_v20 = vld [vmem:[%s1547_s5 + $0x20] sm:$0xff] (!%p284_p3)  ;;  %v446_v42 = vld [vmem:[%s1547_s5 + $0x30] sm:$0xff] (!%p284_p3)  ;;  %vm592_vm1 = vcmask (!%p284_p3), 130048   ;;  %vm850_vm2 = vcmask (!%p284_p3), 7168  }
   0x8   : > { %466 = vperm.xlu0 (!%p284_p3), %1062, %v430_v1   ;;  %637 = vmatprep.mubr.bf16.mxu1 (!%p284_p3), %v1157_v0  ;;  %v1064_v1 = vld [vmem:[%s1544_s2] sm:$0xff] (!%p284_p3)  }
   0x9   : > { %1063 = vset.pattern.permute.xlu1 (!%p284_p3), %v1157_v0 }
   0xc   : > { %471 = vperm.xlu0 (!%p284_p3), %1062, %v431_v2  }
   0xe   : > { %s1555_s24 = smov (!%p334_p4, %s1147_s24), 1 }
   0xf   : > { %s1032_s9 = sshll.u32 %s1555_s24, 7  ;;  %s1034_s22 = sshll.u32 %s1555_s24, 6 }
  0x10   : > { %s1233_s12 = scalar_lea.vmem %s1542_s0, %s1032_s9  ;;  %s1238_s15 = scalar_lea.vmem %s1543_s1, %s1032_s9  ;;  %544 = vperm.xlu0 %1062, %v442_v3  }
  0x11   : > { %v1244_v4 = vld [vmem:[%s1233_s12 + $0x8] sm:$0xff]  ;;  %v1247_v5 = vld [vmem:[%s1233_s12 + $0x18] sm:$0xff]  ;;  %v1258_v9 = vld [vmem:[%s1233_s12] sm:$0xff]  ;;  %s1379_s29 = scalar_lea.vmem %s1548_s6, %s1034_s22  ;;  %s1431_s11 = scalar_lea.vmem %s1549_s7, %s1034_s22 }
  0x12   : > { %v1250_v6 = vld [vmem:[%s1238_s15 + $0x8] sm:$0xff]  ;;  %v1253_v7 = vld [vmem:[%s1238_s15 + $0x18] sm:$0xff]  ;;  %v1261_v10 = vld [vmem:[%s1233_s12 + $0x10] sm:$0xff] }
  0x13   : > { %v413_v8 = vadd.f32 %v1250_v6, %v1244_v4  ;;  %v415_v11 = vadd.f32 %v1253_v7, %v1247_v5  ;;  %v1266_v12 = vld [vmem:[%s1238_s15] sm:$0xff]  ;;  %v1269_v13 = vld [vmem:[%s1238_s15 + $0x10] sm:$0xff]  ;;  %v1272_v14 = vld [vmem:[%s1233_s12 + $0x28] sm:$0xff] }
  0x14   : > { %v412_v15 = vadd.f32 %v1266_v12, %v1258_v9  ;;  %v414_v16 = vadd.f32 %v1269_v13, %v1261_v10  ;;  %v1279_v17 = vld [vmem:[%s1233_s12 + $0x38] sm:$0xff]  ;;  %v1282_v18 = vld [vmem:[%s1238_s15 + $0x28] sm:$0xff]  ;;  %v1295_v24 = vld [vmem:[%s1233_s12 + $0x20] sm:$0xff]  ;;  %554 = vperm.xlu0 %1062, %v444_v20  }
  0x15   : > { %v1285_v19 = vld [vmem:[%s1238_s15 + $0x38] sm:$0xff]  ;;  %v457_v21 = vpack.c.bf16 %v415_v11, %v413_v8  ;;  %v417_v22 = vadd.f32 %v1282_v18, %v1272_v14  ;;  %v1298_v25 = vld [vmem:[%s1233_s12 + $0x30] sm:$0xff]  ;;  %v1301_v26 = vld [vmem:[%s1238_s15 + $0x20] sm:$0xff] }
  0x16   : > { %v419_v23 = vadd.f32 %v1285_v19, %v1279_v17  ;;  %v456_v27 = vpack.c.bf16 %v414_v16, %v412_v15  ;;  %v1304_v28 = vld [vmem:[%s1238_s15 + $0x30] sm:$0xff]  ;;  %v416_v29 = vadd.f32 %v1301_v26, %v1295_v24  ;;  %v1309_v30 = vld [vmem:[%s1233_s12 + $0x48] sm:$0xff]  ;;  %v1312_v31 = vld [vmem:[%s1233_s12 + $0x58] sm:$0xff] }
  0x17   : > { %483 = vmatprep.subr.bf16.mxu0 %v457_v21  ;;  %v418_v33 = vadd.f32 %v1304_v28, %v1298_v25  ;;  %v1317_v34 = vld [vmem:[%s1238_s15 + $0x48] sm:$0xff]  ;;  %v1320_v35 = vld [vmem:[%s1238_s15 + $0x58] sm:$0xff]  ;;  %v1323_v36 = vld [vmem:[%s1233_s12 + $0x40] sm:$0xff] }
  0x18   : > { %v459_v32 = vpack.c.bf16 %v419_v23, %v417_v22  ;;  %484 = vmatpush1.bf16.msra.mxu0 %v456_v27  ;;  %v421_v37 = vadd.f32 %v1317_v34, %v1309_v30  ;;  %v423_v38 = vadd.f32 %v1320_v35, %v1312_v31  ;;  %v1330_v39 = vld [vmem:[%s1233_s12 + $0x50] sm:$0xff]  ;;  %v1333_v40 = vld [vmem:[%s1238_s15 + $0x40] sm:$0xff]  ;;  %v1347_v46 = vld [vmem:[%s1233_s12 + $0x68] sm:$0xff]  ;;  %564 = vperm.xlu0 %1062, %v446_v42  }
  0x19   : > { %v1336_v41 = vld [vmem:[%s1238_s15 + $0x50] sm:$0xff]  ;;  %v458_v43 = vpack.c.bf16 %v418_v33, %v416_v29  ;;  %v420_v44 = vadd.f32 %v1333_v40, %v1323_v36  ;;  %v1350_v47 = vld [vmem:[%s1233_s12 + $0x78] sm:$0xff]  ;;  %v1353_v48 = vld [vmem:[%s1238_s15 + $0x68] sm:$0xff] }
  0x1a   : > { %485 = vmatprep.subr.bf16.mxu0 %v459_v32  ;;  %v422_v45 = vadd.f32 %v1336_v41, %v1330_v39  ;;  %v461_v49 = vpack.c.bf16 %v423_v38, %v421_v37  ;;  %v1356_v50 = vld [vmem:[%s1238_s15 + $0x78] sm:$0xff]  ;;  %v425_v51 = vadd.f32 %v1353_v48, %v1347_v46  ;;  %v1361_v52 = vld [vmem:[%s1233_s12 + $0x60] sm:$0xff]  ;;  %v1364_v53 = vld [vmem:[%s1233_s12 + $0x70] sm:$0xff] }
  0x1b   : > { %v427_v54 = vadd.f32 %v1356_v50, %v1350_v47  ;;  %v1369_v55 = vld [vmem:[%s1238_s15 + $0x60] sm:$0xff]  ;;  %v1372_v56 = vld [vmem:[%s1238_s15 + $0x70] sm:$0xff]  ;;  %v441_v11 = vld [vmem:[%s1547_s5 + $0x8] sm:$0xff] }
  0x1c   : > { %486 = vmatpush1.bf16.msra.mxu0 %v458_v43  ;;  %v460_v57 = vpack.c.bf16 %v422_v45, %v420_v44  ;;  %v424_v58 = vadd.f32 %v1369_v55, %v1361_v52  ;;  %v426_v59 = vadd.f32 %v1372_v56, %v1364_v53  ;;  %v448_v61 = vld [vmem:[%s1379_s29] sm:$0xff]  ;;  %v450_v63 = vld [vmem:[%s1379_s29 + $0x10] sm:$0xff]  ;;  %v443_v15 = vld [vmem:[%s1547_s5 + $0x18] sm:$0xff] }
  0x1d   : > { %487 = vmatprep.subr.bf16.mxu0 %v461_v49  ;;  %v463_v60 = vpack.c.bf16 %v427_v54, %v425_v51  ;;  %680 = vperm.xlu0 %1062, %v448_v61   ;;  %v452_v2 = vld [vmem:[%s1379_s29 + $0x20] sm:$0xff]  ;;  %v454_v3 = vld [vmem:[%s1379_s29 + $0x30] sm:$0xff]  ;;  %v445_v16 = vld [vmem:[%s1547_s5 + $0x28] sm:$0xff] }
  0x1e   : > { %v462_v62 = vpack.c.bf16 %v426_v59, %v424_v58  ;;  %v440_v8 = vld [vmem:[%s1547_s5] sm:$0xff]  ;;  %v447_v20 = vld [vmem:[%s1547_s5 + $0x38] sm:$0xff]  ;;  %v449_v21 = vld [vmem:[%s1379_s29 + $0x8] sm:$0xff] }
  0x1f   : > { %534 = vperm.xlu1 %1063, %v440_v8   ;;  %v451_v22 = vld [vmem:[%s1379_s29 + $0x18] sm:$0xff]  ;;  %v453_v23 = vld [vmem:[%s1379_s29 + $0x28] sm:$0xff]  ;;  %v1065_v61 = vld [vmem:[%s1546_s4] sm:$0xff]  }
  0x20   : > { %488 = vmatpush1.bf16.msra.mxu0 %v460_v57  ;;  %v455_v27 = vld [vmem:[%s1379_s29 + $0x38] sm:$0xff] }
  0x21   : > { %489 = vmatprep.subr.bf16.mxu0 %v463_v60  ;;  %690 = vperm.xlu0 %1062, %v450_v63   ;;  %v1067_v63 = vld [vmem:[%s1546_s4 + $0x10] sm:$0xff]  }
  0x23   : > { %539 = vperm.xlu1 %1063, %v441_v11  }
  0x24   : > { %490 = vmatpush1.bf16.msra.mxu0 %v462_v62  ;;  %v1066_v62 = vld [vmem:[%s1546_s4 + $0x8] sm:$0xff]  }
  0x25   : > { %700 = vperm.xlu0 %1062, %v452_v2  }
  0x27   : > { %1021 = vmatmul.mubr.msk.bf16.vlgmr.msra.gmra.mrb[0].mxu0 %vm479_vm0, %v1064_v1  ;;  %549 = vperm.xlu1 %1063, %v443_v15   ;;  %v1068_v1 = vld [vmem:[%s1546_s4 + $0x18] sm:$0xff]  }
  0x29   : > { %710 = vperm.xlu0 %1062, %v454_v3  }
  0x2b   : > { %559 = vperm.xlu1 %1063, %v445_v16  }
  0x2f   : > { %569 = vperm.xlu1 %1063, %v447_v20  }
  0x33   : > { %685 = vperm.xlu1 %1063, %v449_v21  }
  0x37   : > { %695 = vperm.xlu1 %1063, %v451_v22  }
  0x3b   : > { %705 = vperm.xlu1 %1063, %v453_v23  }
  0x3f   : > { %715 = vperm.xlu1 %1063, %v455_v27  }
  0x87   : > { %v467_v29 = vpop.permute.xlu0 %466 }
  0x8b   : > { %v472_v38 = vpop.permute.xlu0 %471 }
  0x8f   : > { %v545_v8 = vpop.permute.xlu0 %544 }
  0x93   : > { %v555_v15 = vpop.permute.xlu0 %554 }
  0x97   : > { %v1451_v20 = vpop.permute.xlu0 %564 }
  0x9e   : > { %v535_v2 = vpop.permute.xlu1 %534 }
  0xa2   : > { %v540_v3 = vpop.permute.xlu1 %539 }
  0xa6   : > { %v550_v11 = vpop.permute.xlu1 %549 }
  0xaa   : > { %v1449_v16 = vpop.permute.xlu1 %559 }
  0xae   : > { %v1453_v21 = vpop.permute.xlu1 %569 }
  0xfa   : > { %v517_v32 = vpop.f32.mrb[0].mxu0 }
  0xfb   : > { %v518_v33 = vadd.f32 %v517_v32, %v467_v29  ;;  %v519_v37 = vpop.f32.mrb[1].mxu0 }
  0xfc   : > { %v520_v42 = vadd.f32 %v519_v37, %v467_v29  ;;  %v521_v43 = vpop.f32.mrb[2].mxu0  ;;  %v681_v29 = vpop.permute.xlu0 %680 }
  0xfd   : > { %v522_v44 = vadd.f32 %v521_v43, %v472_v38  ;;  %v523_v45 = vpop.f32.mrb[3].mxu0  ;;  %v526_v51 = vmax.f32 %v518_v33, 0.0  ;;  %v686_v43 = vpop.permute.xlu1 %685 }
  0xfe   : > { %v524_v49 = vadd.f32 %v523_v45, %v472_v38  ;;  %v527_v57 = vmax.f32 %v520_v42, 0.0 }
  0xff   : > { %v528_v54 = vmax.f32 %v522_v44, 0.0 }
 0x100   : > { %v529_v58 = vmax.f32 %v524_v49, 0.0 }
 0x101   : > { %v530_v59 = vpack.c.bf16 %v528_v54, %v526_v51 }
 0x102   : > { %v531_v60 = vpack.c.bf16 %v529_v58, %v527_v57 }
 0x104   : > { %605 = vmatprep.subr.bf16.mxu1 %v531_v60 }
 0x105   : > { %606 = vmatpush1.bf16.msra.mxu1 %v530_v59 }
 0x108   : > { %1026 = vmatmul.mubr.msk.bf16.vlgmr.msra.gmra.mrb[0].mxu1 %vm592_vm1, %v1065_v61 }
 0x109   : > { %647 = vmatprep.mubr.bf16.mxu1 %v1157_v0 }
 0x110   : > { %1027 = vmatmul.mubr.msk.bf16.gmra.mrb[4].mxu1 %vm592_vm1, %v1066_v62 }
 0x111   : > { %657 = vmatprep.mubr.bf16.mxu1 %v1157_v0 }
 0x118   : > { %1028 = vmatmul.mubr.msk.bf16.gmra.mrb[8].mxu1 %vm592_vm1, %v1067_v63 }
 0x119   : > { %667 = vmatprep.mubr.bf16.mxu1 %v1157_v0  ;;  %v1158_v0 = vmov 0.0  }
 0x11a   : > { %851 = vst.msk [vmem:[%s1431_s11] sm:$0xff] %vm850_vm2, %v1158_v0  ;;  %852 = vst.msk [vmem:[%s1431_s11 + $0x8] sm:$0xff] %vm850_vm2, %v1158_v0 }
 0x11b   : > { %853 = vst.msk [vmem:[%s1431_s11 + $0x10] sm:$0xff] %vm850_vm2, %v1158_v0  ;;  %854 = vst.msk [vmem:[%s1431_s11 + $0x18] sm:$0xff] %vm850_vm2, %v1158_v0 }
 0x11c   : > { %855 = vst.msk [vmem:[%s1431_s11 + $0x20] sm:$0xff] %vm850_vm2, %v1158_v0  ;;  %856 = vst.msk [vmem:[%s1431_s11 + $0x28] sm:$0xff] %vm850_vm2, %v1158_v0 }
 0x11d   : > { %857 = vst.msk [vmem:[%s1431_s11 + $0x30] sm:$0xff] %vm850_vm2, %v1158_v0  ;;  %858 = vst.msk [vmem:[%s1431_s11 + $0x38] sm:$0xff] %vm850_vm2, %v1158_v0 }
 0x120   : > { %1029 = vmatmul.mubr.msk.bf16.gmra.mrb[12].mxu1 %vm592_vm1, %v1068_v1 }
 0x1db   : > { %v639_v22 = vpop.f32.mrb[0].mxu1 }
 0x1dc   : > { %v640_v23 = vadd.f32 %v639_v22, %v535_v2  ;;  %v641_v27 = vpop.f32.mrb[1].mxu1 }
 0x1dd   : > { %v642_v32 = vadd.f32 %v641_v27, %v535_v2  ;;  %v643_v33 = vpop.f32.mrb[2].mxu1  ;;  %v691_v2 = vpop.permute.xlu0 %690 }
 0x1de   : > { %v718_v37 = vadd.f32 %v681_v29, %v640_v23  ;;  %v644_v38 = vadd.f32 %v643_v33, %v540_v3  ;;  %v645_v42 = vpop.f32.mrb[3].mxu1  ;;  %v696_v33 = vpop.permute.xlu1 %695 }
 0x1df   : > { %v719_v44 = vadd.f32 %v681_v29, %v642_v32  ;;  %v646_v45 = vadd.f32 %v645_v42, %v540_v3 }
 0x1e0   : > { %v734_v49 = vsub.f32 0.0, %v718_v37  ;;  %v720_v51 = vadd.f32 %v686_v43, %v644_v38 }
 0x1e1   : > { %v735_v54 = vsub.f32 0.0, %v719_v44  ;;  %v721_v57 = vadd.f32 %v686_v43, %v646_v45 }
 0x1e2   : > { %v750_v58 = vmul.f32 1.442695, %v734_v49  ;;  %v736_v59 = vsub.f32 0.0, %v720_v51 }
 0x1e3   : > { %v752_v60 = vmul.f32 1.442695, %v735_v54  ;;  %v737_v61 = vsub.f32 0.0, %v721_v57  ;;  %v649_v62 = vpop.f32.mrb[4].mxu1 }
 0x1e4   : > { %1069 = vpow2.f32 %v750_v58  ;;  %v754_v63 = vmul.f32 1.442695, %v736_v59  ;;  %v650_v1 = vadd.f32 %v649_v62, %v545_v8  ;;  %v651_v0 = vpop.f32.mrb[5].mxu1 }
 0x1e5   : > { %1071 = vpow2.f32 %v752_v60  ;;  %v756_v22 = vmul.f32 1.442695, %v737_v61  ;;  %v652_v23 = vadd.f32 %v651_v0, %v545_v8  ;;  %v653_v27 = vpop.f32.mrb[6].mxu1  ;;  %v701_v61 = vpop.permute.xlu0 %700 }
 0x1e6   : > { %1073 = vpow2.f32 %v754_v63  ;;  %v722_v3 = vadd.f32 %v691_v2, %v650_v1  ;;  %v654_v29 = vadd.f32 %v653_v27, %v550_v11  ;;  %v655_v32 = vpop.f32.mrb[7].mxu1  ;;  %v706_v27 = vpop.permute.xlu1 %705 }
 0x1e7   : > { %1075 = vpow2.f32 %v756_v22  ;;  %v723_v37 = vadd.f32 %v691_v2, %v652_v23  ;;  %v656_v38 = vadd.f32 %v655_v32, %v550_v11 }
 0x1e8   : > { %v738_v42 = vsub.f32 0.0, %v722_v3  ;;  %v724_v43 = vadd.f32 %v696_v33, %v654_v29 }
 0x1e9   : > { %v739_v44 = vsub.f32 0.0, %v723_v37  ;;  %v725_v45 = vadd.f32 %v696_v33, %v656_v38 }
 0x1ea   : > { %v758_v49 = vmul.f32 1.442695, %v738_v42  ;;  %v740_v51 = vsub.f32 0.0, %v724_v43 }
 0x1eb   : > { %v760_v54 = vmul.f32 1.442695, %v739_v44  ;;  %v741_v57 = vsub.f32 0.0, %v725_v45  ;;  %v659_v58 = vpop.f32.mrb[8].mxu1 }
 0x1ec   : > { %1077 = vpow2.f32 %v758_v49  ;;  %v762_v8 = vmul.f32 1.442695, %v740_v51  ;;  %v660_v59 = vadd.f32 %v659_v58, %v555_v15  ;;  %v661_v60 = vpop.f32.mrb[9].mxu1 }
 0x1ed   : > { %1079 = vpow2.f32 %v760_v54  ;;  %v764_v62 = vmul.f32 1.442695, %v741_v57  ;;  %v662_v63 = vadd.f32 %v661_v60, %v555_v15  ;;  %v663_v1 = vpop.f32.mrb[10].mxu1 }
 0x1ee   : > { %v1070_v0 = vpop.eup %1069  ;;  %1081 = vpow2.f32 %v762_v8  ;;  %v726_v11 = vadd.f32 %v701_v61, %v660_v59  ;;  %v664_v2 = vadd.f32 %v663_v1, %v1449_v16  ;;  %v665_v22 = vpop.f32.mrb[11].mxu1 }
 0x1ef   : > { %v1072_v23 = vpop.eup %1071  ;;  %v782_v3 = vadd.f32 1.0, %v1070_v0  ;;  %1083 = vpow2.f32 %v764_v62  ;;  %v727_v29 = vadd.f32 %v701_v61, %v662_v63  ;;  %v666_v32 = vadd.f32 %v665_v22, %v1449_v16  ;;  %v711_v63 = vpop.permute.xlu0 %710 }
 0x1f0   : > { %v1074_v33 = vpop.eup %1073  ;;  %v783_v37 = vadd.f32 1.0, %v1072_v23  ;;  %v742_v38 = vsub.f32 0.0, %v726_v11  ;;  %v728_v42 = vadd.f32 %v706_v27, %v664_v2  ;;  %v397_v16 = vsub.f32 %v1244_v4, %v1250_v6 }
 0x1f1   : > { %v1076_v43 = vpop.eup %1075  ;;  %1085 = vrcp.f32 %v782_v3  ;;  %v784_v15 = vadd.f32 1.0, %v1074_v33  ;;  %v743_v44 = vsub.f32 0.0, %v727_v29  ;;  %v729_v45 = vadd.f32 %v706_v27, %v666_v32  ;;  %v716_v29 = vpop.permute.xlu1 %715 }
 0x1f2   : > { %1087 = vrcp.f32 %v783_v37  ;;  %v785_v49 = vadd.f32 1.0, %v1076_v43  ;;  %v766_v51 = vmul.f32 1.442695, %v742_v38  ;;  %v744_v54 = vsub.f32 0.0, %v728_v42 }
 0x1f3   : > { %1089 = vrcp.f32 %v784_v15  ;;  %v768_v57 = vmul.f32 1.442695, %v743_v44  ;;  %v745_v58 = vsub.f32 0.0, %v729_v45  ;;  %v669_v8 = vpop.f32.mrb[12].mxu1  ;;  %v396_v62 = vsub.f32 %v1258_v9, %v1266_v12 }
 0x1f4   : > { %1091 = vrcp.f32 %v785_v49  ;;  %v770_v59 = vmul.f32 1.442695, %v744_v54  ;;  %v670_v60 = vadd.f32 %v669_v8, %v1451_v20  ;;  %v671_v61 = vpop.f32.mrb[13].mxu1  ;;  %v398_v22 = vsub.f32 %v1261_v10, %v1269_v13 }
 0x1f5   : > { %1093 = vpow2.f32 %v766_v51  ;;  %v772_v1 = vmul.f32 1.442695, %v745_v58  ;;  %v672_v0 = vadd.f32 %v671_v61, %v1451_v20  ;;  %v673_v11 = vpop.f32.mrb[14].mxu1 }
 0x1f6   : > { %v1078_v2 = vpop.eup %1077  ;;  %1095 = vpow2.f32 %v768_v57  ;;  %v730_v4 = vadd.f32 %v711_v63, %v670_v60  ;;  %v674_v23 = vadd.f32 %v673_v11, %v1453_v21  ;;  %v675_v27 = vpop.f32.mrb[15].mxu1  ;;  %v399_v57 = vsub.f32 %v1247_v5, %v1253_v7 }
 0x1f7   : > { %v1080_v3 = vpop.eup %1079  ;;  %v786_v32 = vadd.f32 1.0, %v1078_v2  ;;  %1097 = vpow2.f32 %v770_v59  ;;  %v731_v9 = vadd.f32 %v711_v63, %v672_v0  ;;  %v676_v33 = vadd.f32 %v675_v27, %v1453_v21 }
 0x1f8   : > { %v1082_v37 = vpop.eup %1081  ;;  %v787_v38 = vadd.f32 1.0, %v1080_v3  ;;  %1099 = vpow2.f32 %v772_v1  ;;  %v746_v20 = vsub.f32 0.0, %v730_v4  ;;  %v732_v42 = vadd.f32 %v716_v29, %v674_v23 }
 0x1f9   : > { %v1084_v43 = vpop.eup %1083  ;;  %1101 = vrcp.f32 %v786_v32  ;;  %v788_v10 = vadd.f32 1.0, %v1082_v37  ;;  %v747_v15 = vsub.f32 0.0, %v731_v9  ;;  %v733_v44 = vadd.f32 %v716_v29, %v676_v33 }
 0x1fa   : > { %1103 = vrcp.f32 %v787_v38  ;;  %v789_v45 = vadd.f32 1.0, %v1084_v43  ;;  %v774_v49 = vmul.f32 1.442695, %v746_v20  ;;  %v748_v51 = vsub.f32 0.0, %v732_v42 }
 0x1fb   : > { %v1086_v54 = vpop.eup %1085  ;;  %1105 = vrcp.f32 %v788_v10  ;;  %v776_v21 = vmul.f32 1.442695, %v747_v15  ;;  %v749_v58 = vsub.f32 0.0, %v733_v44  ;;  %v402_v37 = vsub.f32 %v1298_v25, %v1304_v28 }
 0x1fc   : > { %v1088_v8 = vpop.eup %1087  ;;  %1107 = vrcp.f32 %v789_v45  ;;  %v778_v59 = vmul.f32 1.442695, %v748_v51  ;;  %v814_v60 = vmul.f32 %v1086_v54, %v396_v62  ;;  %v400_v62 = vsub.f32 %v1295_v24, %v1301_v26 }
 0x1fd   : > { %v1090_v61 = vpop.eup %1089  ;;  %1109 = vpow2.f32 %v774_v49  ;;  %v780_v63 = vmul.f32 1.442695, %v749_v58  ;;  %v815_v1 = vmul.f32 %v1088_v8, %v397_v16  ;;  %v403_v24 = vsub.f32 %v1279_v17, %v1285_v19 }
 0x1fe   : > { %v1092_v0 = vpop.eup %1091  ;;  %1111 = vpow2.f32 %v776_v21  ;;  %v830_v11 = vadd.f32 %v814_v60, %v1266_v12  ;;  %v816_v2 = vmul.f32 %v1090_v61, %v398_v22  ;;  %v401_v12 = vsub.f32 %v1272_v14, %v1282_v18 }
 0x1ff   : > { %v1094_v4 = vpop.eup %1093  ;;  %1113 = vpow2.f32 %v778_v59  ;;  %v831_v5 = vadd.f32 %v815_v1, %v1250_v6  ;;  %v817_v23 = vmul.f32 %v1092_v0, %v399_v57  ;;  %v404_v59 = vsub.f32 %v1323_v36, %v1333_v40 }
 0x200   : > { %v1096_v27 = vpop.eup %1095  ;;  %v790_v3 = vadd.f32 1.0, %v1094_v4  ;;  %1115 = vpow2.f32 %v780_v63  ;;  %v832_v29 = vadd.f32 %v816_v2, %v1269_v13  ;;  %v405_v61 = vsub.f32 %v1309_v30, %v1317_v34 }
 0x201   : > { %v1098_v32 = vpop.eup %1097  ;;  %v791_v16 = vadd.f32 1.0, %v1096_v27  ;;  %v867_v9 = vadd.f32 %v831_v5, %v830_v11  ;;  %v833_v33 = vadd.f32 %v817_v23, %v1253_v7 }
 0x202   : > { %v1100_v22 = vpop.eup %1099  ;;  %1117 = vrcp.f32 %v790_v3  ;;  %v792_v6 = vadd.f32 1.0, %v1098_v32  ;;  %v408_v3 = vsub.f32 %v1361_v52, %v1369_v55  ;;  %v410_v32 = vsub.f32 %v1364_v53, %v1372_v56 }
 0x203   : > { %v1102_v38 = vpop.eup %1101  ;;  %1119 = vrcp.f32 %v791_v16  ;;  %v793_v13 = vadd.f32 1.0, %v1100_v22  ;;  %868 = vadd.xlane.f32.xlu0 %v867_v9  ;;  %v870_v20 = vadd.f32 %v833_v33, %v832_v29 }
 0x204   : > { %v1104_v42 = vpop.eup %1103  ;;  %1121 = vrcp.f32 %v792_v6  ;;  %v818_v7 = vmul.f32 %v1102_v38, %v400_v62  ;;  %v409_v62 = vsub.f32 %v1347_v46, %v1353_v48 }
 0x205   : > { %v1106_v43 = vpop.eup %1105  ;;  %1123 = vrcp.f32 %v793_v13  ;;  %871 = vadd.xlane.f32.xlu1 %v870_v20  ;;  %v819_v14 = vmul.f32 %v1104_v42, %v401_v12  ;;  %v859_v13 = vld [vmem:[%s1431_s11] sm:$0xff]  ;;  %v860_v20 = vld [vmem:[%s1431_s11 + $0x8] sm:$0xff] }
 0x206   : > { %v1108_v10 = vpop.eup %1107  ;;  %v834_v15 = vadd.f32 %v818_v7, %v1301_v26  ;;  %v820_v44 = vmul.f32 %v1106_v43, %v402_v37  ;;  %v862_v43 = vld [vmem:[%s1431_s11 + $0x18] sm:$0xff] }
 0x207   : > { %v1110_v25 = vpop.eup %1109  ;;  %v835_v45 = vadd.f32 %v819_v14, %v1282_v18  ;;  %v821_v49 = vmul.f32 %v1108_v10, %v403_v24 }
 0x208   : > { %v1112_v51 = vpop.eup %1111  ;;  %v794_v54 = vadd.f32 1.0, %v1110_v25  ;;  %v836_v57 = vadd.f32 %v820_v44, %v1304_v28  ;;  %v406_v28 = vsub.f32 %v1330_v39, %v1336_v41  ;;  %v864_v25 = vld [vmem:[%s1431_s11 + $0x28] sm:$0xff] }
 0x209   : > { %v1114_v17 = vpop.eup %1113  ;;  %v795_v21 = vadd.f32 1.0, %v1112_v51  ;;  %v873_v58 = vadd.f32 %v835_v45, %v834_v15  ;;  %v837_v8 = vadd.f32 %v821_v49, %v1285_v19  ;;  %v407_v19 = vsub.f32 %v1312_v31, %v1320_v35  ;;  %v863_v15 = vld [vmem:[%s1431_s11 + $0x20] sm:$0xff] }
 0x20a   : > { %v1116_v60 = vpop.eup %1115  ;;  %1125 = vrcp.f32 %v794_v54  ;;  %v796_v26 = vadd.f32 1.0, %v1114_v17  ;;  %v865_v54 = vld [vmem:[%s1431_s11 + $0x30] sm:$0xff]  ;;  %v866_v17 = vld [vmem:[%s1431_s11 + $0x38] sm:$0xff] }
 0x20b   : > { %1127 = vrcp.f32 %v795_v21  ;;  %v797_v18 = vadd.f32 1.0, %v1116_v60  ;;  %874 = vadd.xlane.f32.xlu0 %v873_v58  ;;  %v876_v63 = vadd.f32 %v837_v8, %v836_v57 }
 0x20c   : > { %v1118_v1 = vpop.eup %1117  ;;  %1129 = vrcp.f32 %v796_v26 }
 0x20d   : > { %v1120_v0 = vpop.eup %1119  ;;  %1131 = vrcp.f32 %v797_v18  ;;  %v822_v36 = vmul.f32 %v1118_v1, %v404_v59 }
 0x20e   : > { %v1122_v11 = vpop.eup %1121  ;;  %v823_v2 = vmul.f32 %v1120_v0, %v405_v61 }
 0x20f   : > { %v1124_v4 = vpop.eup %1123  ;;  %877 = vadd.xlane.f32.xlu0 %v876_v63  ;;  %v838_v30 = vadd.f32 %v822_v36, %v1333_v40  ;;  %v824_v5 = vmul.f32 %v1122_v11, %v406_v28 }
 0x210   : > { %v839_v23 = vadd.f32 %v823_v2, %v1317_v34  ;;  %v825_v27 = vmul.f32 %v1124_v4, %v407_v19  ;;  %v411_v34 = vsub.f32 %v1350_v47, %v1356_v50 }
 0x211   : > { %v840_v39 = vadd.f32 %v824_v5, %v1336_v41 }
 0x212   : > { %v879_v29 = vadd.f32 %v839_v23, %v838_v30  ;;  %v841_v31 = vadd.f32 %v825_v27, %v1320_v35 }
 0x214   : > { %v1126_v16 = vpop.eup %1125  ;;  %880 = vadd.xlane.f32.xlu1 %v879_v29  ;;  %v882_v40 = vadd.f32 %v841_v31, %v840_v39 }
 0x215   : > { %v1128_v9 = vpop.eup %1127  ;;  %v826_v41 = vmul.f32 %v1126_v16, %v408_v3 }
 0x216   : > { %v1130_v33 = vpop.eup %1129  ;;  %883 = vadd.xlane.f32.xlu0 %v882_v40  ;;  %v827_v52 = vmul.f32 %v1128_v9, %v409_v62 }
 0x217   : > { %v1132_v35 = vpop.eup %1131  ;;  %v842_v46 = vadd.f32 %v826_v41, %v1369_v55  ;;  %v828_v12 = vmul.f32 %v1130_v33, %v410_v32 }
 0x218   : > { %v843_v53 = vadd.f32 %v827_v52, %v1353_v48  ;;  %v829_v22 = vmul.f32 %v1132_v35, %v411_v34 }
 0x219   : > { %v844_v6 = vadd.f32 %v828_v12, %v1372_v56 }
 0x21a   : > { %v885_v47 = vadd.f32 %v843_v53, %v842_v46  ;;  %v845_v37 = vadd.f32 %v829_v22, %v1356_v50  ;;  %v861_v50 = vld [vmem:[%s1431_s11 + $0x10] sm:$0xff] }
 0x21c   : > { %886 = vadd.xlane.f32.xlu1 %v885_v47  ;;  %v888_v38 = vadd.f32 %v845_v37, %v844_v6 }
 0x21e   : > { %889 = vadd.xlane.f32.xlu0 %v888_v38 }
 0x290   : > { %v869_v55 = vpop.xlane.xlu0 %868 }
 0x291   : > { %v891_v24 = vadd.f32 %v869_v55, %v859_v13 }
 0x292   : > { %v872_v48 = vpop.xlane.xlu1 %871 }
 0x293   : > { %900 = vst.msk [vmem:[%s1431_s11] sm:$0xff] %vm850_vm2, %v891_v24  ;;  %v892_v56 = vadd.f32 %v872_v48, %v860_v20 }
 0x295   : > { %901 = vst.msk [vmem:[%s1431_s11 + $0x8] sm:$0xff] %vm850_vm2, %v892_v56 }
 0x298   : > { %v875_v42 = vpop.xlane.xlu0 %874 }
 0x299   : > { %v893_v7 = vadd.f32 %v875_v42, %v861_v50 }
 0x29b   : > { %902 = vst.msk [vmem:[%s1431_s11 + $0x10] sm:$0xff] %vm850_vm2, %v893_v7 }
 0x29c   : > { %v878_v14 = vpop.xlane.xlu0 %877 }
 0x29d   : > { %v894_v10 = vadd.f32 %v878_v14, %v862_v43 }
 0x29f   : > { %903 = vst.msk [vmem:[%s1431_s11 + $0x18] sm:$0xff] %vm850_vm2, %v894_v10 }
 0x2a1   : > { %v881_v44 = vpop.xlane.xlu1 %880 }
 0x2a2   : > { %v895_v45 = vadd.f32 %v881_v44, %v863_v15 }
 0x2a3   : > { %v884_v49 = vpop.xlane.xlu0 %883 }
 0x2a4   : > { %904 = vst.msk [vmem:[%s1431_s11 + $0x20] sm:$0xff] %vm850_vm2, %v895_v45  ;;  %v896_v51 = vadd.f32 %v884_v49, %v864_v25 }
 0x2a6   : > { %905 = vst.msk [vmem:[%s1431_s11 + $0x28] sm:$0xff] %vm850_vm2, %v896_v51 }
 0x2a9   : > { %v887_v57 = vpop.xlane.xlu1 %886 }
 0x2aa   : > { %v897_v21 = vadd.f32 %v887_v57, %v865_v54 }
 0x2ab   : > { %v890_v58 = vpop.xlane.xlu0 %889 }
 0x2ac   : > { %906 = vst.msk [vmem:[%s1431_s11 + $0x30] sm:$0xff] %vm850_vm2, %v897_v21  ;;  %v898_v8 = vadd.f32 %v890_v58, %v866_v17 }
 0x2ae   : > { %907 = vst.msk [vmem:[%s1431_s11 + $0x38] sm:$0xff] %vm850_vm2, %v898_v8 }
 0x2af PF: > { %s17_s26 = sadd.s32 1, %s1155_s26   ;;  %s1550_s24 = smov %s1151_s25 }
 0x2b0   : > { %p14_p5 = scmp.ge.s32.totalorder %s17_s26, 4   ;;  %s1551_s25 = smov %s1553_s27 }
 0x2b2   :  { %16 = sbr.rel (!%p14_p5) target bundleno = 2 (0x2), region = 88 }

// kernel: iaff_forward.3
= control target key start
LH: loop header
LB: loop body
LE: loop exit
PB: predicated region body
PF: predicated region fallthrough
CT: control target
= control target key end

     0   :  { %s1784_s27 = smov 0   ;;  %s1786_s28 = smov 0   ;;  %s2279_s0 = inlined_call_operand.vmem [shape: f32[2,64,256], index: 0, kind: input, shape index: {}]   ;;  %s2280_s1 = inlined_call_operand.vmem [shape: f32[2,64,256], index: 1, kind: input, shape index: {}]   ;;  %s2281_s2 = inlined_call_operand.vmem [shape: bf16[2,16,64], index: 2, kind: input, shape index: {}]   ;;  %s2282_s3 = inlined_call_operand.vmem [shape: f32[2,16,1], index: 3, kind: input, shape index: {}]   ;;  %s2283_s4 = inlined_call_operand.vmem [shape: bf16[2,64,16], index: 4, kind: input, shape index: {}]   ;;  %s2284_s5 = inlined_call_operand.vmem [shape: f32[2,64,1], index: 5, kind: input, shape index: {}]   ;;  %s2285_s6 = inlined_call_operand.vmem [shape: f32[2,64,1], index: 6, kind: input, shape index: {}]   ;;  %s2286_s7 = inlined_call_operand.vmem [shape: f32[2,64,1], index: 7, kind: input, shape index: {}]   ;;  %s2287_s8 = inlined_call_operand.vmem [shape: f32[2,64,256], index: 8, kind: output, shape index: {}]  }
   0x1   :  { %s1788_s29 = smov 0  }
   0x2 LB: > { %s30_s30 = sadd.s32 1, %s1732_s28  ;;  %p1473_p0 = scmp.ge.s32.totalorder %s1736_s29, 1  ;;  %s1736_s29 = sphi %s1788_s29, %s18_s29   ;;  %s1732_s28 = sphi %s1786_s28, %s2316_s28   ;;  %s1728_s27 = sphi %s1784_s27, %s2315_s27  }
   0x3   : > { %p32_p1 = scmp.ge.s32.totalorder %s30_s30, 2  ;;  %p320_p2 = scmp.lt.s32.totalorder %s1736_s29, 3 }
   0x5   : > { %s2318_s30 = smov (%p32_p1, %s30_s30), 0  ;;  %p321_p3 = pnand %p1473_p0, %p320_p2 }
   0x7   : > { %324 = sbr.rel (%p321_p3) target bundleno = 1056 (0x420), region = 52 }
   0xe   : > { %p382_p4 = scmp.lt.s32.totalorder %s1728_s27, 1  ;;  %v2288_v0 = vmov 0   ;;  %v488_v1 = vld [vmem:[%s2282_s3] sm:$0xff]  ;;  %v489_v2 = vld [vmem:[%s2282_s3 + $0x8] sm:$0xff]  ;;  %v500_v59 = vld [vmem:[%s2284_s5 + $0x10] sm:$0xff]  ;;  %vm537_vm0 = vcmask 523264  }
   0xf   : > { %573 = vmatprep.mubr.bf16.mxu0 %v2288_v0  ;;  %1558 = vset.pattern.permute.xlu0 %v2288_v0  ;;  %v1560_v62 = vld [vmem:[%s2281_s2] sm:$0xff]   ;;  %vm650_vm1 = vcmask 130048  }
  0x10   : > { %s2320_s27 = smov (!%p382_p4, %s1728_s27), 1  ;;  %524 = vperm.xlu0 %1558, %v488_v1   ;;  %715 = vmatprep.mubr.bf16.mxu1 %v2288_v0  ;;  %v502_v63 = vld [vmem:[%s2284_s5 + $0x20] sm:$0xff] }
  0x11   : > { %1559 = vset.pattern.permute.xlu1 %v2288_v0  ;;  %s1815_s13 = sshll.u32 %s2320_s27, 7  ;;  %s1528_s20 = sshll.u32 %s2320_s27, 6 }
  0x12   : > { %s1821_s16 = scalar_lea.vmem %s2279_s0, %s1815_s13  ;;  %s1827_s19 = scalar_lea.vmem %s2280_s1, %s1815_s13 }
  0x13   : > { %v1830_v3 = vld [vmem:[%s1821_s16 + $0x8] sm:$0xff]  ;;  %v1833_v4 = vld [vmem:[%s1821_s16 + $0x18] sm:$0xff]  ;;  %v1844_v8 = vld [vmem:[%s1821_s16] sm:$0xff]  ;;  %s1925_s23 = scalar_lea.vmem %s2285_s6, %s1528_s20  ;;  %s2003_s12 = scalar_lea.vmem %s2286_s7, %s1528_s20 }
  0x14   : > { %v1836_v5 = vld [vmem:[%s1827_s19 + $0x8] sm:$0xff]  ;;  %529 = vperm.xlu0 %1558, %v489_v2   ;;  %v1839_v6 = vld [vmem:[%s1827_s19 + $0x18] sm:$0xff]  ;;  %v1847_v9 = vld [vmem:[%s1821_s16 + $0x10] sm:$0xff]  ;;  %s2221_s18 = scalar_lea.vmem %s2287_s8, %s1815_s13 }
  0x15   : > { %v471_v7 = vadd.f32 %v1836_v5, %v1830_v3  ;;  %v473_v10 = vadd.f32 %v1839_v6, %v1833_v4  ;;  %v1852_v11 = vld [vmem:[%s1827_s19] sm:$0xff]  ;;  %v1855_v12 = vld [vmem:[%s1827_s19 + $0x10] sm:$0xff]  ;;  %v1858_v13 = vld [vmem:[%s1821_s16 + $0x28] sm:$0xff] }
  0x16   : > { %v470_v14 = vadd.f32 %v1852_v11, %v1844_v8  ;;  %v472_v15 = vadd.f32 %v1855_v12, %v1847_v9  ;;  %v1865_v16 = vld [vmem:[%s1821_s16 + $0x38] sm:$0xff]  ;;  %v1868_v17 = vld [vmem:[%s1827_s19 + $0x28] sm:$0xff]  ;;  %v1876_v21 = vld [vmem:[%s1821_s16 + $0x20] sm:$0xff] }
  0x17   : > { %2300 = vst [vmem:[#allocation2_spill] sm:$0xff] %v1865_v16  ;;  %v1871_v18 = vld [vmem:[%s1827_s19 + $0x38] sm:$0xff]  ;;  %v515_v19 = vpack.c.bf16 %v473_v10, %v471_v7  ;;  %v475_v20 = vadd.f32 %v1868_v17, %v1858_v13  ;;  %v1879_v22 = vld [vmem:[%s1821_s16 + $0x30] sm:$0xff]  ;;  %v1882_v23 = vld [vmem:[%s1827_s19 + $0x20] sm:$0xff] }
  0x18   : > { %2301 = vst [vmem:[#allocation3_spill] sm:$0xff] %v1871_v18  ;;  %v514_v24 = vpack.c.bf16 %v472_v15, %v470_v14  ;;  %v477_v25 = vadd.f32 %v1871_v18, %v1865_v16  ;;  %v1888_v26 = vld [vmem:[%s1827_s19 + $0x30] sm:$0xff]  ;;  %v474_v27 = vadd.f32 %v1882_v23, %v1876_v21  ;;  %v1893_v28 = vld [vmem:[%s1821_s16 + $0x48] sm:$0xff]  ;;  %v1896_v29 = vld [vmem:[%s1821_s16 + $0x58] sm:$0xff] }
  0x19   : > { %541 = vmatprep.subr.bf16.mxu0 %v515_v19  ;;  %v476_v30 = vadd.f32 %v1888_v26, %v1879_v22  ;;  %v1901_v31 = vld [vmem:[%s1827_s19 + $0x48] sm:$0xff]  ;;  %v1904_v32 = vld [vmem:[%s1827_s19 + $0x58] sm:$0xff]  ;;  %v1907_v33 = vld [vmem:[%s1821_s16 + $0x40] sm:$0xff] }
  0x1a   : > { %542 = vmatpush1.bf16.msra.mxu0 %v514_v24  ;;  %v517_v34 = vpack.c.bf16 %v477_v25, %v475_v20  ;;  %v479_v35 = vadd.f32 %v1901_v31, %v1893_v28  ;;  %v1912_v36 = vld [vmem:[%s1821_s16 + $0x50] sm:$0xff]  ;;  %v1915_v37 = vld [vmem:[%s1827_s19 + $0x40] sm:$0xff]  ;;  %v481_v40 = vadd.f32 %v1904_v32, %v1896_v29  ;;  %v1930_v41 = vld [vmem:[%s1821_s16 + $0x68] sm:$0xff] }
  0x1b   : > { %v1918_v38 = vld [vmem:[%s1827_s19 + $0x50] sm:$0xff]  ;;  %v516_v39 = vpack.c.bf16 %v476_v30, %v474_v27  ;;  %2302 = vst [vmem:[#allocation4_spill] sm:$0xff] %v1930_v41  ;;  %v1933_v42 = vld [vmem:[%s1821_s16 + $0x78] sm:$0xff]  ;;  %v1936_v43 = vld [vmem:[%s1827_s19 + $0x68] sm:$0xff]  ;;  %v478_v44 = vadd.f32 %v1915_v37, %v1907_v33 }
  0x1c   : > { %2303 = vst [vmem:[#allocation5_spill] sm:$0xff] %v1933_v42  ;;  %543 = vmatprep.subr.bf16.mxu0 %v517_v34  ;;  %v480_v45 = vadd.f32 %v1918_v38, %v1912_v36  ;;  %v1943_v46 = vld [vmem:[%s1827_s19 + $0x78] sm:$0xff]  ;;  %v483_v47 = vadd.f32 %v1936_v43, %v1930_v41  ;;  %v1948_v48 = vld [vmem:[%s1821_s16 + $0x60] sm:$0xff]  ;;  %v1951_v49 = vld [vmem:[%s1821_s16 + $0x70] sm:$0xff]  ;;  %v519_v50 = vpack.c.bf16 %v481_v40, %v479_v35 }
  0x1d   : > { %2304 = vst [vmem:[#allocation6_spill] sm:$0xff] %v1943_v46  ;;  %2305 = vst [vmem:[#allocation7_spill] sm:$0xff] %v1951_v49  ;;  %v485_v51 = vadd.f32 %v1943_v46, %v1933_v42  ;;  %v1956_v52 = vld [vmem:[%s1827_s19 + $0x60] sm:$0xff]  ;;  %v1959_v53 = vld [vmem:[%s1827_s19 + $0x70] sm:$0xff] }
  0x1e   : > { %2306 = vst [vmem:[#allocation8_spill] sm:$0xff] %v1959_v53  ;;  %v506_v54 = vld [vmem:[%s1925_s23] sm:$0xff]  ;;  %544 = vmatpush1.bf16.msra.mxu0 %v516_v39  ;;  %v518_v55 = vpack.c.bf16 %v480_v45, %v478_v44  ;;  %v482_v56 = vadd.f32 %v1956_v52, %v1948_v48  ;;  %v484_v58 = vadd.f32 %v1959_v53, %v1951_v49  ;;  %v508_v61 = vld [vmem:[%s1925_s23 + $0x10] sm:$0xff]  ;;  %v499_v35 = vld [vmem:[%s2284_s5 + $0x8] sm:$0xff] }
  0x1f   : > { %545 = vmatprep.subr.bf16.mxu0 %v519_v50  ;;  %v521_v57 = vpack.c.bf16 %v485_v51, %v483_v47  ;;  %738 = vperm.xlu0 %1558, %v506_v54   ;;  %v510_v1 = vld [vmem:[%s1925_s23 + $0x20] sm:$0xff]  ;;  %v504_v2 = vld [vmem:[%s2284_s5 + $0x30] sm:$0xff]  ;;  %v507_v39 = vld [vmem:[%s1925_s23 + $0x8] sm:$0xff] }
  0x20   : > { %v520_v60 = vpack.c.bf16 %v484_v58, %v482_v56  ;;  %v512_v7 = vld [vmem:[%s1925_s23 + $0x30] sm:$0xff]  ;;  %v1506_v14 = vld [vmem:[%s2284_s5 + $0x40] sm:$0xff]  ;;  %v501_v40 = vld [vmem:[%s2284_s5 + $0x18] sm:$0xff] }
  0x21   : > { %v1496_v10 = vld [vmem:[%s2282_s3 + $0x10] sm:$0xff]  ;;  %v1510_v19 = vld [vmem:[%s2284_s5 + $0x60] sm:$0xff]  ;;  %v509_v44 = vld [vmem:[%s1925_s23 + $0x18] sm:$0xff] }
  0x22   : > { %546 = vmatpush1.bf16.msra.mxu0 %v518_v55  ;;  %v1508_v15 = vld [vmem:[%s2284_s5 + $0x50] sm:$0xff]  ;;  %v928_v24 = vld [vmem:[%s2003_s12] sm:$0xff]  ;;  %v503_v45 = vld [vmem:[%s2284_s5 + $0x28] sm:$0xff] }
  0x23   : > { %547 = vmatprep.subr.bf16.mxu0 %v521_v57  ;;  %602 = vperm.xlu0 %1558, %v500_v59   ;;  %v1512_v20 = vld [vmem:[%s2284_s5 + $0x70] sm:$0xff]  ;;  %v932_v27 = vld [vmem:[%s2003_s12 + $0x20] sm:$0xff]  ;;  %v511_v47 = vld [vmem:[%s1925_s23 + $0x28] sm:$0xff] }
  0x24   : > { %v930_v25 = vld [vmem:[%s2003_s12 + $0x10] sm:$0xff]  ;;  %v498_v34 = vld [vmem:[%s2284_s5] sm:$0xff]  ;;  %v505_v50 = vld [vmem:[%s2284_s5 + $0x38] sm:$0xff] }
  0x25   : > { %v934_v30 = vld [vmem:[%s2003_s12 + $0x30] sm:$0xff]  ;;  %592 = vperm.xlu1 %1559, %v498_v34   ;;  %v513_v51 = vld [vmem:[%s1925_s23 + $0x38] sm:$0xff]  ;;  %v1507_v55 = vld [vmem:[%s2284_s5 + $0x48] sm:$0xff] }
  0x26   : > { %548 = vmatpush1.bf16.msra.mxu0 %v520_v60  ;;  %v1497_v54 = vld [vmem:[%s2282_s3 + $0x18] sm:$0xff]  ;;  %v1511_v57 = vld [vmem:[%s2284_s5 + $0x68] sm:$0xff] }
  0x27   : > { %748 = vperm.xlu0 %1558, %v508_v61   ;;  %v1509_v56 = vld [vmem:[%s2284_s5 + $0x58] sm:$0xff]  ;;  %v929_v59 = vld [vmem:[%s2003_s12 + $0x8] sm:$0xff] }
  0x28   : > { %v1513_v58 = vld [vmem:[%s2284_s5 + $0x78] sm:$0xff]  ;;  %v933_v61 = vld [vmem:[%s2003_s12 + $0x28] sm:$0xff] }
  0x29   : > { %1485 = vmatmul.mubr.msk.bf16.vlgmr.msra.gmra.mrb[0].mxu0 %vm537_vm0, %v1560_v62  ;;  %597 = vperm.xlu1 %1559, %v499_v35   ;;  %v931_v60 = vld [vmem:[%s2003_s12 + $0x18] sm:$0xff] }
  0x2a   : > { %695 = vmatprep.mubr.bf16.mxu0 %v2288_v0  ;;  %v935_v62 = vld [vmem:[%s2003_s12 + $0x38] sm:$0xff] }
  0x2b   : > { %612 = vperm.xlu0 %1558, %v502_v63  }
  0x2d   : > { %743 = vperm.xlu1 %1559, %v507_v39  }
  0x2f   : > { %758 = vperm.xlu0 %1558, %v510_v1  }
  0x31   : > { %607 = vperm.xlu1 %1559, %v501_v40   ;;  %v1561_v40 = vld [vmem:[%s2283_s4] sm:$0xff]  }
  0x33   : > { %622 = vperm.xlu0 %1558, %v504_v2  }
  0x35   : > { %753 = vperm.xlu1 %1559, %v509_v44   ;;  %v1562_v44 = vld [vmem:[%s2283_s4 + $0x10] sm:$0xff]  }
  0x37   : > { %768 = vperm.xlu0 %1558, %v512_v7  }
  0x39   : > { %617 = vperm.xlu1 %1559, %v503_v45   ;;  %v1563_v45 = vld [vmem:[%s2283_s4 + $0x8] sm:$0xff]  }
  0x3b   : > { %946 = vperm.xlu0 %1558, %v1496_v10  }
  0x3d   : > { %763 = vperm.xlu1 %1559, %v511_v47   ;;  %v1564_v47 = vld [vmem:[%s2283_s4 + $0x18] sm:$0xff]  }
  0x3f   : > { %1013 = vperm.xlu0 %1558, %v1506_v14  }
  0x41   : > { %627 = vperm.xlu1 %1559, %v505_v50  }
  0x43   : > { %1023 = vperm.xlu0 %1558, %v1508_v15  }
  0x45   : > { %773 = vperm.xlu1 %1559, %v513_v51  }
  0x47   : > { %1033 = vperm.xlu0 %1558, %v1510_v19  }
  0x49   : > { %951 = vperm.xlu1 %1559, %v1497_v54  }
  0x4b   : > { %1043 = vperm.xlu0 %1558, %v1512_v20  }
  0x4d   : > { %1018 = vperm.xlu1 %1559, %v1507_v55  }
  0x4f   : > { %1158 = vperm.xlu0 %1558, %v928_v24  }
  0x51   : > { %1028 = vperm.xlu1 %1559, %v1509_v56  }
  0x53   : > { %1168 = vperm.xlu0 %1558, %v930_v25  }
  0x55   : > { %1038 = vperm.xlu1 %1559, %v1511_v57  }
  0x57   : > { %1178 = vperm.xlu0 %1558, %v932_v27  }
  0x59   : > { %1048 = vperm.xlu1 %1559, %v1513_v58  }
  0x5b   : > { %1188 = vperm.xlu0 %1558, %v934_v30  }
  0x5d   : > { %1163 = vperm.xlu1 %1559, %v929_v59  }
  0x61   : > { %1173 = vperm.xlu1 %1559, %v931_v60  }
  0x65   : > { %1183 = vperm.xlu1 %1559, %v933_v61  }
  0x69   : > { %1193 = vperm.xlu1 %1559, %v935_v62  }
  0x8f   : > { %v525_v63 = vpop.permute.xlu0 %524 }
  0x93   : > { %v530_v10 = vpop.permute.xlu0 %529 }
  0x9e   : > { %v739_v51 = vpop.permute.xlu0 %738 }
  0xa2   : > { %v603_v55 = vpop.permute.xlu0 %602 }
  0xa4   : > { %v593_v50 = vpop.permute.xlu1 %592 }
  0xa6   : > { %v2067_v57 = vpop.permute.xlu0 %748 }
  0xa8   : > { %v598_v54 = vpop.permute.xlu1 %597 }
  0xaa   : > { %v613_v59 = vpop.permute.xlu0 %612 }
  0xac   : > { %v744_v56 = vpop.permute.xlu1 %743 }
  0xae   : > { %v759_v61 = vpop.permute.xlu0 %758 }
  0xb0   : > { %v2069_v58 = vpop.permute.xlu1 %607 }
  0xb4   : > { %v2071_v60 = vpop.permute.xlu1 %753 }
  0xb8   : > { %v618_v62 = vpop.permute.xlu1 %617 }
  0xfc   : > { %v575_v1 = vpop.f32.mrb[0].mxu0 }
  0xfd   : > { %v576_v2 = vadd.f32 %v575_v1, %v525_v63  ;;  %v577_v7 = vpop.f32.mrb[1].mxu0 }
  0xfe   : > { %v578_v14 = vadd.f32 %v577_v7, %v525_v63  ;;  %v579_v15 = vpop.f32.mrb[2].mxu0  ;;  %v623_v63 = vpop.permute.xlu0 %622 }
  0xff   : > { %v580_v19 = vadd.f32 %v579_v15, %v530_v10  ;;  %v581_v20 = vpop.f32.mrb[3].mxu0  ;;  %v584_v25 = vmax.f32 %v576_v2, 0.0 }
 0x100   : > { %v582_v24 = vadd.f32 %v581_v20, %v530_v10  ;;  %v585_v30 = vmax.f32 %v578_v14, 0.0 }
 0x101   : > { %v586_v27 = vmax.f32 %v580_v19, 0.0 }
 0x102   : > { %v587_v34 = vmax.f32 %v582_v24, 0.0 }
 0x103   : > { %v588_v35 = vpack.c.bf16 %v586_v27, %v584_v25 }
 0x104   : > { %v589_v39 = vpack.c.bf16 %v587_v34, %v585_v30 }
 0x106   : > { %663 = vmatprep.subr.bf16.mxu0 %v589_v39  ;;  %1531 = vmatprep.subr.bf16.mxu1 %v589_v39 }
 0x107   : > { %664 = vmatpush1.bf16.msra.mxu0 %v588_v35  ;;  %1532 = vmatpush1.bf16.msra.mxu1 %v588_v35 }
 0x10a   : > { %1490 = vmatmul.mubr.msk.bf16.vlgmr.msra.gmra.mrb[4].mxu0 %vm650_vm1, %v1561_v40  ;;  %1492 = vmatmul.mubr.msk.bf16.vlgmr.msra.gmra.mrb[0].mxu1 %vm650_vm1, %v1562_v44  ;;  %v764_v44 = vpop.permute.xlu1 %763 }
 0x10b   : > { %705 = vmatprep.mubr.bf16.mxu0 %v2288_v0  ;;  %725 = vmatprep.mubr.bf16.mxu1 %v2288_v0 }
 0x112   : > { %1491 = vmatmul.mubr.msk.bf16.gmra.mrb[8].mxu0 %vm650_vm1, %v1563_v45  ;;  %1493 = vmatmul.mubr.msk.bf16.gmra.mrb[4].mxu1 %vm650_vm1, %v1564_v47 }
 0x113   : > { %994 = vmatprep.mubr.bf16.mxu0 %v2288_v0  ;;  %1115 = vmatprep.mubr.bf16.mxu1 %v2288_v0 }
 0x1dd   : > { %v697_v1 = vpop.f32.mrb[4].mxu0  ;;  %v717_v2 = vpop.f32.mrb[0].mxu1 }
 0x1de   : > { %v698_v7 = vadd.f32 %v697_v1, %v593_v50  ;;  %v718_v10 = vadd.f32 %v717_v2, %v613_v59  ;;  %v699_v14 = vpop.f32.mrb[5].mxu0  ;;  %v719_v15 = vpop.f32.mrb[1].mxu1 }
 0x1df   : > { %v700_v19 = vadd.f32 %v699_v14, %v593_v50  ;;  %v720_v20 = vadd.f32 %v719_v15, %v613_v59  ;;  %v701_v24 = vpop.f32.mrb[6].mxu0  ;;  %v721_v25 = vpop.f32.mrb[2].mxu1 }
 0x1e0   : > { %v776_v27 = vadd.f32 %v739_v51, %v698_v7  ;;  %v784_v30 = vadd.f32 %v759_v61, %v718_v10  ;;  %v702_v34 = vadd.f32 %v701_v24, %v598_v54  ;;  %v722_v35 = vadd.f32 %v721_v25, %v618_v62  ;;  %v703_v39 = vpop.f32.mrb[7].mxu0  ;;  %v723_v40 = vpop.f32.mrb[3].mxu1 }
 0x1e1   : > { %v777_v45 = vadd.f32 %v739_v51, %v700_v19  ;;  %v785_v47 = vadd.f32 %v759_v61, %v720_v20  ;;  %v704_v0 = vadd.f32 %v703_v39, %v598_v54  ;;  %v724_v42 = vadd.f32 %v723_v40, %v618_v62  ;;  %v769_v25 = vpop.permute.xlu0 %768 }
 0x1e2   : > { %v792_v46 = vsub.f32 0.0, %v776_v27  ;;  %v800_v1 = vsub.f32 0.0, %v784_v30  ;;  %v778_v2 = vadd.f32 %v744_v56, %v702_v34  ;;  %v786_v16 = vadd.f32 %v764_v44, %v722_v35 }
 0x1e3   : > { %v793_v18 = vsub.f32 0.0, %v777_v45  ;;  %v801_v50 = vsub.f32 0.0, %v785_v47  ;;  %v779_v59 = vadd.f32 %v744_v56, %v704_v0  ;;  %v787_v14 = vadd.f32 %v764_v44, %v724_v42 }
 0x1e4   : > { %v808_v15 = vmul.f32 1.442695, %v792_v46  ;;  %v824_v7 = vmul.f32 1.442695, %v800_v1  ;;  %v794_v10 = vsub.f32 0.0, %v778_v2  ;;  %v802_v24 = vsub.f32 0.0, %v786_v16  ;;  %v628_v2 = vpop.permute.xlu1 %627 }
 0x1e5   : > { %v810_v49 = vmul.f32 1.442695, %v793_v18  ;;  %v826_v53 = vmul.f32 1.442695, %v801_v50  ;;  %v795_v41 = vsub.f32 0.0, %v779_v59  ;;  %v803_v51 = vsub.f32 0.0, %v787_v14 }
 0x1e6   : > { %1570 = vpow2.f32 %v808_v15  ;;  %v812_v54 = vmul.f32 1.442695, %v794_v10  ;;  %v707_v61 = vpop.f32.mrb[8].mxu0  ;;  %v727_v62 = vpop.f32.mrb[4].mxu1  ;;  %v828_v19 = vmul.f32 1.442695, %v802_v24 }
 0x1e7   : > { %1572 = vpow2.f32 %v824_v7  ;;  %v814_v20 = vmul.f32 1.442695, %v795_v41  ;;  %v708_v27 = vadd.f32 %v707_v61, %v603_v55  ;;  %v709_v30 = vpop.f32.mrb[9].mxu0  ;;  %v729_v0 = vpop.f32.mrb[5].mxu1  ;;  %v728_v42 = vadd.f32 %v727_v62, %v623_v63 }
 0x1e8   : > { %1574 = vpow2.f32 %v810_v49  ;;  %v710_v46 = vadd.f32 %v709_v30, %v603_v55  ;;  %v730_v56 = vadd.f32 %v729_v0, %v623_v63  ;;  %v711_v16 = vpop.f32.mrb[10].mxu0  ;;  %v731_v34 = vpop.f32.mrb[6].mxu1  ;;  %v830_v18 = vmul.f32 1.442695, %v803_v51 }
 0x1e9   : > { %1576 = vpow2.f32 %v826_v53  ;;  %v780_v35 = vadd.f32 %v2067_v57, %v708_v27  ;;  %v713_v39 = vpop.f32.mrb[11].mxu0  ;;  %v733_v40 = vpop.f32.mrb[7].mxu1  ;;  %v788_v44 = vadd.f32 %v769_v25, %v728_v42  ;;  %v712_v49 = vadd.f32 %v711_v16, %v2069_v58 }
 0x1ea   : > { %1578 = vpow2.f32 %v812_v54  ;;  %v781_v45 = vadd.f32 %v2067_v57, %v710_v46  ;;  %v789_v41 = vadd.f32 %v769_v25, %v730_v56  ;;  %v732_v57 = vadd.f32 %v731_v34, %v628_v2 }
 0x1eb   : > { %1580 = vpow2.f32 %v828_v19  ;;  %v796_v47 = vsub.f32 0.0, %v780_v35  ;;  %v804_v55 = vsub.f32 0.0, %v788_v44  ;;  %v782_v15 = vadd.f32 %v2071_v60, %v712_v49  ;;  %v774_v19 = vpop.permute.xlu1 %773 }
 0x1ec   : > { %1582 = vpow2.f32 %v814_v20  ;;  %v797_v63 = vsub.f32 0.0, %v781_v45  ;;  %v805_v1 = vsub.f32 0.0, %v789_v41  ;;  %v714_v25 = vadd.f32 %v713_v39, %v2069_v58 }
 0x1ed   : > { %1584 = vpow2.f32 %v830_v18  ;;  %v816_v53 = vmul.f32 1.442695, %v796_v47  ;;  %v832_v50 = vmul.f32 1.442695, %v804_v55  ;;  %v734_v61 = vadd.f32 %v733_v40, %v628_v2 }
 0x1ee   : > { %v818_v59 = vmul.f32 1.442695, %v797_v63  ;;  %v834_v14 = vmul.f32 1.442695, %v805_v1  ;;  %v798_v27 = vsub.f32 0.0, %v782_v15  ;;  %v790_v42 = vadd.f32 %v774_v19, %v732_v57 }
 0x1ef   : > { %1586 = vpow2.f32 %v816_v53  ;;  %v783_v16 = vadd.f32 %v2071_v60, %v714_v25  ;;  %v791_v18 = vadd.f32 %v774_v19, %v734_v61  ;;  %v2081_v1 = vsub.f32 %v1844_v8, %v1852_v11 }
 0x1f0   : > { %v1571_v7 = vpop.eup %1570  ;;  %1588 = vpow2.f32 %v832_v50  ;;  %v820_v40 = vmul.f32 1.442695, %v798_v27  ;;  %v806_v45 = vsub.f32 0.0, %v790_v42  ;;  %v2085_v50 = vsub.f32 %v1907_v33, %v1915_v37 }
 0x1f1   : > { %v1573_v10 = vpop.eup %1572  ;;  %v840_v24 = vadd.f32 1.0, %v1571_v7  ;;  %1590 = vpow2.f32 %v818_v59  ;;  %v799_v47 = vsub.f32 0.0, %v783_v16  ;;  %v807_v55 = vsub.f32 0.0, %v791_v18 }
 0x1f2   : > { %v1575_v51 = vpop.eup %1574  ;;  %v848_v54 = vadd.f32 1.0, %v1573_v10  ;;  %1592 = vpow2.f32 %v834_v14  ;;  %v836_v2 = vmul.f32 1.442695, %v806_v45  ;;  %v2089_v15 = vsub.f32 %v1830_v3, %v1836_v5 }
 0x1f3   : > { %v1577_v62 = vpop.eup %1576  ;;  %1594 = vrcp.f32 %v840_v24  ;;  %v841_v20 = vadd.f32 1.0, %v1575_v51  ;;  %v822_v59 = vmul.f32 1.442695, %v799_v47  ;;  %v2093_v7 = vsub.f32 %v1847_v9, %v1855_v12 }
 0x1f4   : > { %v1579_v30 = vpop.eup %1578  ;;  %1596 = vrcp.f32 %v848_v54  ;;  %v849_v0 = vadd.f32 1.0, %v1577_v62  ;;  %v838_v57 = vmul.f32 1.442695, %v807_v55  ;;  %v2097_v8 = vsub.f32 %v1893_v28, %v1901_v31 }
 0x1f5   : > { %v1581_v46 = vpop.eup %1580  ;;  %1598 = vrcp.f32 %v841_v20  ;;  %v842_v56 = vadd.f32 1.0, %v1579_v30  ;;  %v2101_v33 = vsub.f32 %v1912_v36, %v1918_v38  ;;  %v2105_v25 = vsub.f32 %v1833_v4, %v1839_v6 }
 0x1f6   : > { %v1583_v34 = vpop.eup %1582  ;;  %1600 = vrcp.f32 %v849_v0  ;;  %v850_v58 = vadd.f32 1.0, %v1581_v46  ;;  %v2110_v54 = vsub.f32 %v1896_v29, %v1904_v32 }
 0x1f7   : > { %v1585_v35 = vpop.eup %1584  ;;  %1602 = vrcp.f32 %v842_v56  ;;  %v843_v39 = vadd.f32 1.0, %v1583_v34 }
 0x1f8   : > { %1604 = vrcp.f32 %v850_v58  ;;  %v851_v44 = vadd.f32 1.0, %v1585_v35 }
 0x1f9   : > { %v1587_v41 = vpop.eup %1586  ;;  %1606 = vrcp.f32 %v843_v39 }
 0x1fa   : > { %v1589_v49 = vpop.eup %1588  ;;  %1608 = vrcp.f32 %v851_v44  ;;  %v844_v3 = vadd.f32 1.0, %v1587_v41 }
 0x1fb   : > { %v1591_v63 = vpop.eup %1590  ;;  %1610 = vpow2.f32 %v820_v40  ;;  %v852_v19 = vadd.f32 1.0, %v1589_v49 }
 0x1fc   : > { %v1593_v60 = vpop.eup %1592  ;;  %1612 = vpow2.f32 %v836_v2  ;;  %v845_v56 = vadd.f32 1.0, %v1591_v63  ;;  %v2139_v63 = vsub.f32 %v1879_v22, %v1888_v26 }
 0x1fd   : > { %v1595_v53 = vpop.eup %1594  ;;  %1614 = vpow2.f32 %v822_v59  ;;  %v853_v44 = vadd.f32 1.0, %v1593_v60 }
 0x1fe   : > { %v1597_v14 = vpop.eup %1596  ;;  %v872_v9 = vmul.f32 %v1595_v53, %v2081_v1  ;;  %1616 = vpow2.f32 %v838_v57  ;;  %v2144_v53 = vsub.f32 %v1948_v48, %v1956_v52  ;;  %v2311_v48 = vld [vmem:[#allocation2_spill] sm:$0xff] }
 0x1ff   : > { %v1599_v10 = vpop.eup %1598  ;;  %v880_v28 = vmul.f32 %v1597_v14, %v2085_v50  ;;  %1618 = vrcp.f32 %v844_v3  ;;  %v2309_v3 = vld [vmem:[#allocation7_spill] sm:$0xff] }
 0x200   : > { %v1601_v24 = vpop.eup %1600  ;;  %v873_v36 = vmul.f32 %v1599_v10, %v2089_v15  ;;  %v888_v0 = vadd.f32 %v872_v9, %v1852_v11  ;;  %v2307_v10 = vld [vmem:[#allocation4_spill] sm:$0xff] }
 0x201   : > { %v1603_v51 = vpop.eup %1602  ;;  %v881_v20 = vmul.f32 %v1601_v24, %v2097_v8  ;;  %v2122_v34 = vadd.f32 %v880_v28, %v1915_v37  ;;  %v2153_v22 = vsub.f32 %v2307_v10, %v1936_v43  ;;  %v2308_v24 = vld [vmem:[#allocation8_spill] sm:$0xff]  ;;  %v2310_v28 = vld [vmem:[#allocation3_spill] sm:$0xff] }
 0x202   : > { %v1605_v61 = vpop.eup %1604  ;;  %v874_v62 = vmul.f32 %v1603_v51, %v2093_v7  ;;  %v889_v35 = vadd.f32 %v873_v36, %v1836_v5  ;;  %v2157_v9 = vsub.f32 %v2309_v3, %v2308_v24  ;;  %v1567_v10 = vld [vmem:[%s2283_s4 + $0x28] sm:$0xff]   ;;  %v1569_v3 = vld [vmem:[%s2283_s4 + $0x38] sm:$0xff]  }
 0x203   : > { %v1607_v4 = vpop.eup %1606  ;;  %v882_v27 = vmul.f32 %v1605_v61, %v2101_v33  ;;  %v897_v11 = vadd.f32 %v881_v20, %v1901_v31  ;;  %v2135_v31 = vsub.f32 %v1876_v21, %v1882_v23  ;;  %v2148_v21 = vsub.f32 %v1858_v13, %v1868_v17 }
 0x204   : > { %v1609_v30 = vpop.eup %1608  ;;  %v875_v29 = vmul.f32 %v1607_v4, %v2105_v25  ;;  %v890_v42 = vadd.f32 %v874_v62, %v1855_v12  ;;  %v2161_v61 = vsub.f32 %v2311_v48, %v2310_v28  ;;  %v2312_v62 = vld [vmem:[#allocation6_spill] sm:$0xff]  ;;  %v2313_v4 = vld [vmem:[#allocation5_spill] sm:$0xff] }
 0x205   : > { %v1611_v46 = vpop.eup %1610  ;;  %v883_v16 = vmul.f32 %v1609_v30, %v2110_v54  ;;  %v2125_v58 = vadd.f32 %v882_v27, %v1918_v38 }
 0x206   : > { %v846_v18 = vadd.f32 1.0, %v1611_v46  ;;  %v891_v39 = vadd.f32 %v875_v29, %v1839_v6  ;;  %v936_v40 = vpack.c.bf16 %v890_v42, %v888_v0  ;;  %v1613_v38 = vpop.eup %1612 }
 0x207   : > { %v899_v12 = vadd.f32 %v883_v16, %v1904_v32  ;;  %v940_v45 = vpack.c.bf16 %v2125_v58, %v2122_v34  ;;  %v1615_v47 = vpop.eup %1614  ;;  %v854_v5 = vadd.f32 1.0, %v1613_v38  ;;  %v952_v38 = vpop.permute.xlu1 %951 }
 0x208   : > { %1620 = vrcp.f32 %v846_v18  ;;  %v937_v37 = vpack.c.bf16 %v891_v39, %v889_v35  ;;  %v1617_v6 = vpop.eup %1616  ;;  %v847_v49 = vadd.f32 1.0, %v1615_v47 }
 0x209   : > { %1622 = vrcp.f32 %v852_v19  ;;  %v941_v41 = vpack.c.bf16 %v899_v12, %v897_v11  ;;  %v855_v32 = vadd.f32 1.0, %v1617_v6  ;;  %v1619_v55 = vpop.eup %1618  ;;  %v2167_v19 = vsub.f32 %v2313_v4, %v2312_v62 }
 0x20a   : > { %1624 = vrcp.f32 %v845_v56  ;;  %962 = vmatprep.subr.bf16.mxu0 %v937_v37  ;;  %v876_v60 = vmul.f32 %v1619_v55, %v2135_v31 }
 0x20b   : > { %1626 = vrcp.f32 %v853_v44  ;;  %963 = vmatpush1.bf16.msra.mxu0 %v936_v40 }
 0x20c   : > { %1628 = vrcp.f32 %v854_v5  ;;  %v892_v36 = vadd.f32 %v876_v60, %v1882_v23 }
 0x20d   : > { %1630 = vrcp.f32 %v847_v49 }
 0x20e   : > { %1632 = vrcp.f32 %v855_v32 }
 0x212   : > { %v1621_v2 = vpop.eup %1620 }
 0x213   : > { %v1623_v59 = vpop.eup %1622  ;;  %v878_v14 = vmul.f32 %v1621_v2, %v2139_v63 }
 0x214   : > { %v1625_v57 = vpop.eup %1624  ;;  %v884_v20 = vmul.f32 %v1623_v59, %v2144_v53 }
 0x215   : > { %v1627_v51 = vpop.eup %1626  ;;  %v894_v13 = vadd.f32 %v878_v14, %v1888_v26  ;;  %v877_v30 = vmul.f32 %v1625_v57, %v2148_v21  ;;  %v1566_v14 = vld [vmem:[%s2283_s4 + $0x20] sm:$0xff]   ;;  %v2314_v57 = vmov 0  }
 0x216   : > { %v1629_v27 = vpop.eup %1628  ;;  %v885_v42 = vmul.f32 %v1627_v51, %v2153_v22  ;;  %v900_v16 = vadd.f32 %v884_v20, %v1956_v52  ;;  %v1565_v52 = vld [vmem:[%s2281_s2 + $0x8] sm:$0xff]  }
 0x217   : > { %v938_v29 = vpack.c.bf16 %v894_v13, %v892_v36  ;;  %v1631_v0 = vpop.eup %1630  ;;  %v886_v46 = vmul.f32 %v1629_v27, %v2157_v9  ;;  %v893_v58 = vadd.f32 %v877_v30, %v1868_v17  ;;  %v947_v17 = vpop.permute.xlu0 %946 }
 0x218   : > { %v1633_v56 = vpop.eup %1632  ;;  %v879_v23 = vmul.f32 %v1631_v0, %v2161_v61  ;;  %v901_v35 = vadd.f32 %v885_v42, %v1936_v43 }
 0x219   : > { %v887_v26 = vmul.f32 %v1633_v56, %v2167_v19  ;;  %v902_v34 = vadd.f32 %v886_v46, %v2308_v24  ;;  %v1568_v24 = vld [vmem:[%s2283_s4 + $0x30] sm:$0xff]  }
 0x21a   : > { %v895_v18 = vadd.f32 %v879_v23, %v2310_v28  ;;  %v1019_v28 = vpop.permute.xlu1 %1018 }
 0x21b   : > { %v903_v39 = vadd.f32 %v887_v26, %v2312_v62  ;;  %v942_v40 = vpack.c.bf16 %v902_v34, %v900_v16  ;;  %v1014_v51 = vpop.permute.xlu0 %1013 }
 0x21c   : > { %v939_v44 = vpack.c.bf16 %v895_v18, %v893_v58 }
 0x21d   : > { %v943_v11 = vpack.c.bf16 %v903_v39, %v901_v35 }
 0x21e   : > { %964 = vmatprep.subr.bf16.mxu0 %v939_v44  ;;  %v1029_v36 = vpop.permute.xlu1 %1028 }
 0x21f   : > { %965 = vmatpush1.bf16.msra.mxu0 %v938_v29  ;;  %v1024_v48 = vpop.permute.xlu0 %1023 }
 0x220   : > { %966 = vmatprep.subr.bf16.mxu0 %v941_v41 }
 0x222   : > { %v2204_v62 = vpop.permute.xlu1 %1038 }
 0x223   : > { %967 = vmatpush1.bf16.msra.mxu0 %v940_v45  ;;  %v1034_v13 = vpop.permute.xlu0 %1033 }
 0x224   : > { %968 = vmatprep.subr.bf16.mxu0 %v943_v11 }
 0x226   : > { %v2208_v20 = vpop.permute.xlu1 %1048 }
 0x227   : > { %969 = vmatpush1.bf16.msra.mxu0 %v942_v40  ;;  %v2206_v4 = vpop.permute.xlu0 %1043 }
 0x22a   : > { %1515 = vmatmul.mubr.msk.bf16.vlgmr.msra.gmra.mrb[12].mxu0 %vm537_vm0, %v1565_v52  ;;  %v1164_v16 = vpop.permute.xlu1 %1163 }
 0x22b   : > { %v1159_v0 = vpop.permute.xlu0 %1158 }
 0x2fd   : > { %v996_v12 = vpop.f32.mrb[12].mxu0 }
 0x2fe   : > { %v997_v43 = vadd.f32 %v996_v12, %v947_v17  ;;  %v998_v37 = vpop.f32.mrb[13].mxu0 }
 0x2ff   : > { %v999_v47 = vadd.f32 %v998_v37, %v947_v17  ;;  %v1000_v5 = vpop.f32.mrb[14].mxu0 }
 0x300   : > { %v1001_v6 = vadd.f32 %v1000_v5, %v952_v38  ;;  %v1002_v49 = vpop.f32.mrb[15].mxu0  ;;  %v1005_v41 = vmax.f32 %v997_v43, 0.0 }
 0x301   : > { %v1003_v32 = vadd.f32 %v1002_v49, %v952_v38  ;;  %v1006_v55 = vmax.f32 %v999_v47, 0.0  ;;  %v1169_v47 = vpop.permute.xlu0 %1168 }
 0x302   : > { %v1007_v45 = vmax.f32 %v1001_v6, 0.0 }
 0x303   : > { %v1008_v60 = vmax.f32 %v1003_v32, 0.0 }
 0x304   : > { %v1009_v2 = vpack.c.bf16 %v1007_v45, %v1005_v41 }
 0x305   : > { %v1010_v59 = vpack.c.bf16 %v1008_v60, %v1006_v55  ;;  %v1174_v55 = vpop.permute.xlu1 %1173 }
 0x307   : > { %1083 = vmatprep.subr.bf16.mxu1 %v1010_v59 }
 0x308   : > { %1084 = vmatpush1.bf16.msra.mxu1 %v1009_v2 }
 0x30b   : > { %1520 = vmatmul.mubr.msk.bf16.vlgmr.msra.gmra.mrb[8].mxu1 %vm650_vm1, %v1566_v14 }
 0x30c   : > { %1125 = vmatprep.mubr.bf16.mxu1 %v2314_v57 }
 0x313   : > { %1521 = vmatmul.mubr.msk.bf16.gmra.mrb[12].mxu1 %vm650_vm1, %v1567_v10 }
 0x314   : > { %1135 = vmatprep.mubr.bf16.mxu1 %v2314_v57 }
 0x31b   : > { %1522 = vmatmul.mubr.msk.bf16.gmra.mrb[16].mxu1 %vm650_vm1, %v1568_v24 }
 0x31c   : > { %1145 = vmatprep.mubr.bf16.mxu1 %v2314_v57 }
 0x323   : > { %1523 = vmatmul.mubr.msk.bf16.gmra.mrb[20].mxu1 %vm650_vm1, %v1569_v3 }
 0x3de   : > { %v1117_v27 = vpop.f32.mrb[8].mxu1 }
 0x3df   : > { %v1118_v30 = vadd.f32 %v1117_v27, %v1014_v51  ;;  %v1119_v29 = vpop.f32.mrb[9].mxu1 }
 0x3e0   : > { %v1120_v42 = vadd.f32 %v1119_v29, %v1014_v51  ;;  %v1121_v46 = vpop.f32.mrb[10].mxu1 }
 0x3e1   : > { %v1196_v56 = vadd.f32 %v1159_v0, %v1118_v30  ;;  %v1122_v23 = vadd.f32 %v1121_v46, %v1019_v28  ;;  %v1123_v26 = vpop.f32.mrb[11].mxu1 }
 0x3e2   : > { %v1197_v34 = vadd.f32 %v1159_v0, %v1120_v42  ;;  %v1124_v58 = vadd.f32 %v1123_v26, %v1019_v28  ;;  %v1179_v0 = vpop.permute.xlu0 %1178 }
 0x3e3   : > { %v1212_v18 = vsub.f32 0.0, %v1196_v56  ;;  %v1198_v35 = vadd.f32 %v1164_v16, %v1122_v23 }
 0x3e4   : > { %v1213_v39 = vsub.f32 0.0, %v1197_v34  ;;  %v1199_v40 = vadd.f32 %v1164_v16, %v1124_v58  ;;  %v1184_v58 = vpop.permute.xlu1 %1183 }
 0x3e5   : > { %v1228_v44 = vmul.f32 1.442695, %v1212_v18  ;;  %v1214_v11 = vsub.f32 0.0, %v1198_v35 }
 0x3e6   : > { %v1230_v52 = vmul.f32 1.442695, %v1213_v39  ;;  %v1215_v17 = vsub.f32 0.0, %v1199_v40  ;;  %v1127_v12 = vpop.f32.mrb[12].mxu1 }
 0x3e7   : > { %1634 = vpow2.f32 %v1228_v44  ;;  %v1232_v43 = vmul.f32 1.442695, %v1214_v11  ;;  %v1128_v37 = vadd.f32 %v1127_v12, %v1024_v48  ;;  %v1129_v38 = vpop.f32.mrb[13].mxu1 }
 0x3e8   : > { %1636 = vpow2.f32 %v1230_v52  ;;  %v1234_v5 = vmul.f32 1.442695, %v1215_v17  ;;  %v1130_v6 = vadd.f32 %v1129_v38, %v1024_v48  ;;  %v1131_v49 = vpop.f32.mrb[14].mxu1 }
 0x3e9   : > { %1638 = vpow2.f32 %v1232_v43  ;;  %v1200_v32 = vadd.f32 %v1169_v47, %v1128_v37  ;;  %v1132_v41 = vadd.f32 %v1131_v49, %v1029_v36  ;;  %v1133_v45 = vpop.f32.mrb[15].mxu1 }
 0x3ea   : > { %1640 = vpow2.f32 %v1234_v5  ;;  %v1201_v60 = vadd.f32 %v1169_v47, %v1130_v6  ;;  %v1134_v2 = vadd.f32 %v1133_v45, %v1029_v36  ;;  %v1189_v45 = vpop.permute.xlu0 %1188 }
 0x3eb   : > { %v1216_v59 = vsub.f32 0.0, %v1200_v32  ;;  %v1202_v14 = vadd.f32 %v1174_v55, %v1132_v41 }
 0x3ec   : > { %v1217_v57 = vsub.f32 0.0, %v1201_v60  ;;  %v1203_v10 = vadd.f32 %v1174_v55, %v1134_v2 }
 0x3ed   : > { %v1236_v24 = vmul.f32 1.442695, %v1216_v59  ;;  %v1218_v3 = vsub.f32 0.0, %v1202_v14 }
 0x3ee   : > { %v1238_v51 = vmul.f32 1.442695, %v1217_v57  ;;  %v1219_v28 = vsub.f32 0.0, %v1203_v10  ;;  %v1137_v27 = vpop.f32.mrb[16].mxu1 }
 0x3ef   : > { %1642 = vpow2.f32 %v1236_v24  ;;  %v1240_v48 = vmul.f32 1.442695, %v1218_v3  ;;  %v1138_v30 = vadd.f32 %v1137_v27, %v1034_v13  ;;  %v1139_v29 = vpop.f32.mrb[17].mxu1  ;;  %v1194_v3 = vpop.permute.xlu1 %1193 }
 0x3f0   : > { %1644 = vpow2.f32 %v1238_v51  ;;  %v1242_v42 = vmul.f32 1.442695, %v1219_v28  ;;  %v1140_v46 = vadd.f32 %v1139_v29, %v1034_v13  ;;  %v1141_v56 = vpop.f32.mrb[18].mxu1 }
 0x3f1   : > { %v1635_v23 = vpop.eup %1634  ;;  %1646 = vpow2.f32 %v1240_v48  ;;  %v1204_v36 = vadd.f32 %v1179_v0, %v1138_v30  ;;  %v1142_v26 = vadd.f32 %v1141_v56, %v2204_v62  ;;  %v1143_v16 = vpop.f32.mrb[19].mxu1 }
 0x3f2   : > { %v1637_v34 = vpop.eup %1636  ;;  %v1260_v18 = vadd.f32 1.0, %v1635_v23  ;;  %1648 = vpow2.f32 %v1242_v42  ;;  %v1205_v35 = vadd.f32 %v1179_v0, %v1140_v46  ;;  %v1144_v39 = vadd.f32 %v1143_v16, %v2204_v62 }
 0x3f3   : > { %v1639_v40 = vpop.eup %1638  ;;  %v1261_v44 = vadd.f32 1.0, %v1637_v34  ;;  %v1220_v11 = vsub.f32 0.0, %v1204_v36  ;;  %v1206_v52 = vadd.f32 %v1184_v58, %v1142_v26 }
 0x3f4   : > { %v1641_v17 = vpop.eup %1640  ;;  %1650 = vrcp.f32 %v1260_v18  ;;  %v1262_v13 = vadd.f32 1.0, %v1639_v40  ;;  %v1221_v12 = vsub.f32 0.0, %v1205_v35  ;;  %v1207_v43 = vadd.f32 %v1184_v58, %v1144_v39 }
 0x3f5   : > { %1652 = vrcp.f32 %v1261_v44  ;;  %v1263_v37 = vadd.f32 1.0, %v1641_v17  ;;  %v1244_v38 = vmul.f32 1.442695, %v1220_v11  ;;  %v1222_v47 = vsub.f32 0.0, %v1206_v52  ;;  %v1698_v52 = vld [vmem:[%s1827_s19] sm:$0xff] }
 0x3f6   : > { %1654 = vrcp.f32 %v1262_v13  ;;  %v1246_v5 = vmul.f32 1.442695, %v1221_v12  ;;  %v1223_v6 = vsub.f32 0.0, %v1207_v43  ;;  %v1147_v49 = vpop.f32.mrb[20].mxu1  ;;  %v1699_v12 = vld [vmem:[%s1827_s19 + $0x8] sm:$0xff] }
 0x3f7   : > { %1656 = vrcp.f32 %v1263_v37  ;;  %v1248_v32 = vmul.f32 1.442695, %v1222_v47  ;;  %v1148_v62 = vadd.f32 %v1147_v49, %v2206_v4  ;;  %v1149_v41 = vpop.f32.mrb[21].mxu1  ;;  %v1701_v49 = vld [vmem:[%s1827_s19 + $0x18] sm:$0xff] }
 0x3f8   : > { %1658 = vpow2.f32 %v1244_v38  ;;  %v1250_v55 = vmul.f32 1.442695, %v1223_v6  ;;  %v1150_v60 = vadd.f32 %v1149_v41, %v2206_v4  ;;  %v1151_v2 = vpop.f32.mrb[22].mxu1 }
 0x3f9   : > { %v1643_v59 = vpop.eup %1642  ;;  %1660 = vpow2.f32 %v1246_v5  ;;  %v1208_v14 = vadd.f32 %v1189_v45, %v1148_v62  ;;  %v1152_v57 = vadd.f32 %v1151_v2, %v2208_v20  ;;  %v1153_v10 = vpop.f32.mrb[23].mxu1 }
 0x3fa   : > { %v1645_v24 = vpop.eup %1644  ;;  %v1264_v51 = vadd.f32 1.0, %v1643_v59  ;;  %1662 = vpow2.f32 %v1248_v32  ;;  %v1209_v28 = vadd.f32 %v1189_v45, %v1150_v60  ;;  %v1154_v27 = vadd.f32 %v1153_v10, %v2208_v20 }
 0x3fb   : > { %v1647_v48 = vpop.eup %1646  ;;  %v1265_v30 = vadd.f32 1.0, %v1645_v24  ;;  %1664 = vpow2.f32 %v1250_v55  ;;  %v1224_v29 = vsub.f32 0.0, %v1208_v14  ;;  %v1210_v0 = vadd.f32 %v1194_v3, %v1152_v57  ;;  %v1702_v57 = vld [vmem:[%s1827_s19 + $0x20] sm:$0xff] }
 0x3fc   : > { %v1649_v4 = vpop.eup %1648  ;;  %1666 = vrcp.f32 %v1264_v51  ;;  %v1266_v42 = vadd.f32 1.0, %v1647_v48  ;;  %v1225_v46 = vsub.f32 0.0, %v1209_v28  ;;  %v1211_v56 = vadd.f32 %v1194_v3, %v1154_v27  ;;  %v1703_v51 = vld [vmem:[%s1827_s19 + $0x28] sm:$0xff]  ;;  %v1704_v48 = vld [vmem:[%s1827_s19 + $0x30] sm:$0xff] }
 0x3fd   : > { %1668 = vrcp.f32 %v1265_v30  ;;  %v1267_v23 = vadd.f32 1.0, %v1649_v4  ;;  %v1252_v36 = vmul.f32 1.442695, %v1224_v29  ;;  %v1226_v26 = vsub.f32 0.0, %v1210_v0  ;;  %v1705_v0 = vld [vmem:[%s1827_s19 + $0x38] sm:$0xff] }
 0x3fe   : > { %v1651_v16 = vpop.eup %1650  ;;  %1670 = vrcp.f32 %v1266_v42  ;;  %v1254_v34 = vmul.f32 1.442695, %v1225_v46  ;;  %v1227_v20 = vsub.f32 0.0, %v1211_v56 }
 0x3ff   : > { %v1653_v58 = vpop.eup %1652  ;;  %v1292_v18 = vmul.f32 %v1651_v16, %v2081_v1  ;;  %1672 = vrcp.f32 %v1267_v23  ;;  %v1256_v35 = vmul.f32 1.442695, %v1226_v26 }
 0x400   : > { %v1655_v39 = vpop.eup %1654  ;;  %v1293_v40 = vmul.f32 %v1653_v58, %v2089_v15  ;;  %1674 = vpow2.f32 %v1252_v36  ;;  %v1258_v44 = vmul.f32 1.442695, %v1227_v20  ;;  %v1700_v15 = vld [vmem:[%s1827_s19 + $0x10] sm:$0xff]  ;;  %v1706_v20 = vld [vmem:[%s1827_s19 + $0x40] sm:$0xff] }
 0x401   : > { %v1657_v11 = vpop.eup %1656  ;;  %v1308_v17 = vadd.f32 %v1698_v52, %v1292_v18  ;;  %v1294_v1 = vmul.f32 %v1655_v39, %v2093_v7  ;;  %1676 = vpow2.f32 %v1254_v34 }
 0x402   : > { %v1659_v13 = vpop.eup %1658  ;;  %v1309_v43 = vadd.f32 %v1699_v12, %v1293_v40  ;;  %v1295_v37 = vmul.f32 %v1657_v11, %v2105_v25  ;;  %1678 = vpow2.f32 %v1256_v35  ;;  %v1707_v35 = vld [vmem:[%s1827_s19 + $0x48] sm:$0xff]  ;;  %v1709_v11 = vld [vmem:[%s1827_s19 + $0x58] sm:$0xff]  ;;  %v1710_v12 = vld [vmem:[%s1827_s19 + $0x60] sm:$0xff] }
 0x403   : > { %v1661_v38 = vpop.eup %1660  ;;  %1324 = vst [vmem:[%s2221_s18] sm:$0xff] %v1308_v17  ;;  %v1310_v47 = vadd.f32 %v1700_v15, %v1294_v1  ;;  %v1268_v5 = vadd.f32 1.0, %v1659_v13  ;;  %1680 = vpow2.f32 %v1258_v44  ;;  %v1708_v44 = vld [vmem:[%s1827_s19 + $0x50] sm:$0xff] }
 0x404   : > { %v1663_v6 = vpop.eup %1662  ;;  %1325 = vst [vmem:[%s2221_s18 + $0x8] sm:$0xff] %v1309_v43  ;;  %v1311_v32 = vadd.f32 %v1701_v49, %v1295_v37  ;;  %v1269_v7 = vadd.f32 1.0, %v1661_v38  ;;  %v1711_v38 = vld [vmem:[%s1827_s19 + $0x68] sm:$0xff]  ;;  %v1713_v49 = vld [vmem:[%s1827_s19 + $0x78] sm:$0xff] }
 0x405   : > { %v1665_v62 = vpop.eup %1664  ;;  %1326 = vst [vmem:[%s2221_s18 + $0x10] sm:$0xff] %v1310_v47  ;;  %1682 = vrcp.f32 %v1268_v5  ;;  %v1270_v41 = vadd.f32 1.0, %v1663_v6  ;;  %v1712_v5 = vld [vmem:[%s1827_s19 + $0x70] sm:$0xff] }
 0x406   : > { %v1667_v25 = vpop.eup %1666  ;;  %1327 = vst [vmem:[%s2221_s18 + $0x18] sm:$0xff] %v1311_v32  ;;  %1684 = vrcp.f32 %v1269_v7  ;;  %v1271_v45 = vadd.f32 1.0, %v1665_v62 }
 0x407   : > { %v1669_v55 = vpop.eup %1668  ;;  %v1296_v60 = vmul.f32 %v1667_v25, %v2135_v31  ;;  %1686 = vrcp.f32 %v1270_v41 }
 0x408   : > { %v1671_v2 = vpop.eup %1670  ;;  %v1297_v59 = vmul.f32 %v1669_v55, %v2148_v21  ;;  %1688 = vrcp.f32 %v1271_v45 }
 0x409   : > { %v1673_v14 = vpop.eup %1672  ;;  %v1312_v10 = vadd.f32 %v1702_v57, %v1296_v60  ;;  %v1298_v24 = vmul.f32 %v1671_v2, %v2139_v63 }
 0x40a   : > { %v1675_v3 = vpop.eup %1674  ;;  %v1313_v28 = vadd.f32 %v1703_v51, %v1297_v59  ;;  %v1299_v27 = vmul.f32 %v1673_v14, %v2161_v61 }
 0x40b   : > { %v1677_v31 = vpop.eup %1676  ;;  %1328 = vst [vmem:[%s2221_s18 + $0x20] sm:$0xff] %v1312_v10  ;;  %v1314_v30 = vadd.f32 %v1704_v48, %v1298_v24  ;;  %v1272_v21 = vadd.f32 1.0, %v1675_v3 }
 0x40c   : > { %v1679_v29 = vpop.eup %1678  ;;  %1329 = vst [vmem:[%s2221_s18 + $0x28] sm:$0xff] %v1313_v28  ;;  %v1315_v4 = vadd.f32 %v1705_v0, %v1299_v27  ;;  %v1273_v42 = vadd.f32 1.0, %v1677_v31 }
 0x40d   : > { %v1681_v46 = vpop.eup %1680  ;;  %1330 = vst [vmem:[%s2221_s18 + $0x30] sm:$0xff] %v1314_v30  ;;  %1690 = vrcp.f32 %v1272_v21  ;;  %v1274_v63 = vadd.f32 1.0, %v1679_v29 }
 0x40e   : > { %1331 = vst [vmem:[%s2221_s18 + $0x38] sm:$0xff] %v1315_v4  ;;  %1692 = vrcp.f32 %v1273_v42  ;;  %v1275_v61 = vadd.f32 1.0, %v1681_v46 }
 0x40f   : > { %v1683_v56 = vpop.eup %1682  ;;  %1694 = vrcp.f32 %v1274_v63 }
 0x410   : > { %v1685_v23 = vpop.eup %1684  ;;  %v1300_v36 = vmul.f32 %v1683_v56, %v2085_v50  ;;  %1696 = vrcp.f32 %v1275_v61 }
 0x411   : > { %v1687_v26 = vpop.eup %1686  ;;  %v1301_v16 = vmul.f32 %v1685_v23, %v2097_v8 }
 0x412   : > { %v1689_v34 = vpop.eup %1688  ;;  %v1316_v58 = vadd.f32 %v1706_v20, %v1300_v36  ;;  %v1302_v18 = vmul.f32 %v1687_v26, %v2101_v33 }
 0x413   : > { %v1317_v39 = vadd.f32 %v1707_v35, %v1301_v16  ;;  %v1303_v40 = vmul.f32 %v1689_v34, %v2110_v54 }
 0x414   : > { %1332 = vst [vmem:[%s2221_s18 + $0x40] sm:$0xff] %v1316_v58  ;;  %v1318_v50 = vadd.f32 %v1708_v44, %v1302_v18 }
 0x415   : > { %1333 = vst [vmem:[%s2221_s18 + $0x48] sm:$0xff] %v1317_v39  ;;  %v1319_v52 = vadd.f32 %v1709_v11, %v1303_v40 }
 0x416   : > { %1334 = vst [vmem:[%s2221_s18 + $0x50] sm:$0xff] %v1318_v50 }
 0x417   : > { %v1691_v8 = vpop.eup %1690  ;;  %1335 = vst [vmem:[%s2221_s18 + $0x58] sm:$0xff] %v1319_v52 }
 0x418   : > { %v1693_v33 = vpop.eup %1692  ;;  %v1304_v17 = vmul.f32 %v1691_v8, %v2144_v53 }
 0x419   : > { %v1695_v1 = vpop.eup %1694  ;;  %v1305_v54 = vmul.f32 %v1693_v33, %v2153_v22 }
 0x41a   : > { %v1697_v13 = vpop.eup %1696  ;;  %v1320_v43 = vadd.f32 %v1710_v12, %v1304_v17  ;;  %v1306_v37 = vmul.f32 %v1695_v1, %v2157_v9 }
 0x41b   : > { %v1321_v15 = vadd.f32 %v1711_v38, %v1305_v54  ;;  %v1307_v47 = vmul.f32 %v1697_v13, %v2167_v19 }
 0x41c   : > { %1336 = vst [vmem:[%s2221_s18 + $0x60] sm:$0xff] %v1320_v43  ;;  %v1322_v6 = vadd.f32 %v1712_v5, %v1306_v37 }
 0x41d   : > { %1337 = vst [vmem:[%s2221_s18 + $0x68] sm:$0xff] %v1321_v15  ;;  %v1323_v53 = vadd.f32 %v1713_v49, %v1307_v47 }
 0x41e   : > { %1338 = vst [vmem:[%s2221_s18 + $0x70] sm:$0xff] %v1322_v6 }
 0x41f   : > { %1339 = vst [vmem:[%s2221_s18 + $0x78] sm:$0xff] %v1323_v53 }
 0x420 PF: > { %s18_s29 = sadd.s32 1, %s1736_s29   ;;  %s2315_s27 = smov %s1732_s28 }
 0x421   : > { %p15_p5 = scmp.ge.s32.totalorder %s18_s29, 4   ;;  %s2316_s28 = smov %s2318_s30 }
 0x423   :  { %17 = sbr.rel (!%p15_p5) target bundleno = 2 (0x2), region = 95 }

</bundles_post_ra>
